<compile_context>
chip_gen: v6e
topology: v6e:2x2x1
jax: 0.10.0
libtpu: 0.0.40
codegen_flags: <defaults>
</compile_context>

<pallas_src>
import jax
import jax.numpy as jnp
from jax import lax
from jax.experimental import pallas as pl
from jax.experimental.pallas import tpu as pltpu


# ----------------------------------------------------------------------------
# Single fused kernel: init Linear + BN, hoisted layer-0 projections, unrolled
# multi-layer LSTM time loop, deferred vocab projection.
# ----------------------------------------------------------------------------
def _make_decoder_kernel(num_layers, B_real, Bp, T, H):
    four_h = 4 * H

    def kernel(*refs):
        (feat_ref, w_init_ref, b_init_ref, gamma_ref, beta_ref, tgt_ref) = refs[:6]
        layer_refs = refs[6:6 + 3 * num_layers]      # per layer: W_ih (in,4H), W_hh (H,4H), b (1,4H)
        w_out_ref = refs[6 + 3 * num_layers]         # (H, Vp)
        b_out_ref = refs[7 + 3 * num_layers]         # (1, Vp)
        out_ref = refs[8 + 3 * num_layers]           # (T*Bp, Vp)
        htop_scr = refs[9 + 3 * num_layers]          # (T*Bp, H) VMEM scratch

        # ---- init_linear + BatchNorm1d (train-mode stats over the REAL batch rows) ----
        x0 = jnp.dot(feat_ref[...], w_init_ref[...], preferred_element_type=jnp.float32)
        x0 = x0 + b_init_ref[...]
        row = lax.broadcasted_iota(jnp.int32, (Bp, 1), 0)
        valid = (row < B_real).astype(jnp.float32)
        inv_b = 1.0 / float(B_real)
        mean = jnp.sum(x0 * valid, axis=0, keepdims=True) * inv_b
        cent = x0 - mean
        var = jnp.sum(cent * cent * valid, axis=0, keepdims=True) * inv_b  # biased var
        feats_e = cent * lax.rsqrt(var + 1e-5) * gamma_ref[...] + beta_ref[...]  # (Bp, E)

        # ---- hoisted layer-0 input projections for ALL steps (bias folded in once) ----
        w_ih0 = layer_refs[0][...]                   # (E, 4H)
        b0 = layer_refs[2][...]                      # (1, 4H)
        proj_feat = jnp.dot(feats_e, w_ih0, preferred_element_type=jnp.float32) + b0      # (Bp, 4H)
        proj_tgt = jnp.dot(tgt_ref[...], w_ih0, preferred_element_type=jnp.float32) + b0  # (T*Bp, 4H)

        # ---- hoisted weight loads / bias broadcasts for upper layers ----
        w_hh = [layer_refs[3 * l + 1][...] for l in range(num_layers)]
        w_ih_up = {}
        b_up = {}
        for l in range(1, num_layers):
            w_ih_up[l] = layer_refs[3 * l][...]
            b_up[l] = jnp.broadcast_to(layer_refs[3 * l + 2][...], (Bp, four_h))

        h = [jnp.zeros((Bp, H), jnp.float32) for _ in range(num_layers)]
        c = [jnp.zeros((Bp, H), jnp.float32) for _ in range(num_layers)]

        def cell(gates, c_prev):
            # PyTorch gate order along the 4H axis: i, f, g, o
            i_g = jax.nn.sigmoid(gates[:, 0:H])
            f_g = jax.nn.sigmoid(gates[:, H:2 * H])
            g_g = jnp.tanh(gates[:, 2 * H:3 * H])
            o_g = jax.nn.sigmoid(gates[:, 3 * H:4 * H])
            c_new = f_g * c_prev + i_g * g_g
            h_new = o_g * jnp.tanh(c_new)
            return h_new, c_new

        # ---- time loop, statically unrolled: it == 0  <->  PyTorch step == -1 ----
        for it in range(T + 1):
            xproj = proj_feat if it == 0 else proj_tgt[(it - 1) * Bp: it * Bp]
            gates0 = xproj + jnp.dot(h[0], w_hh[0], preferred_element_type=jnp.float32)
            h[0], c[0] = cell(gates0, c[0])
            x = h[0]
            for l in range(1, num_layers):
                gates = (jnp.dot(x, w_ih_up[l], preferred_element_type=jnp.float32)
                         + jnp.dot(h[l], w_hh[l], preferred_element_type=jnp.float32)
                         + b_up[l])
                h[l], c[l] = cell(gates, c[l])
                x = h[l]
            if it >= 1:                                # step >= 0: collect top hidden
                htop_scr[(it - 1) * Bp: it * Bp, :] = x

        # ---- deferred vocab projection: one batched matmul + one lane-dense store ----
        logits = (jnp.dot(htop_scr[...], w_out_ref[...], preferred_element_type=jnp.float32)
                  + b_out_ref[...])
        out_ref[...] = logits

    return kernel


# ----------------------------------------------------------------------------
# Wrapper = DecoderRNN.forward(features, captions) with beam=None, states=None.
# `params` holds the PyTorch-layout tensors; re-layout (transpose, gate fusion,
# lane padding) is done here, once, outside the kernel.
# ----------------------------------------------------------------------------
def decoder_rnn_forward(features, captions, params, hidden_size, vocab_size):
    (w_init, b_init, gamma, beta, embed_w, lstm_layers, w_out, b_out) = params
    B, Fdim = features.shape
    T = captions.shape[1]
    E = w_init.shape[0]
    H = hidden_size
    V = vocab_size
    L = len(lstm_layers)

    Bp = ((B + 7) // 8) * 8          # pad batch to full sublane groups
    Vp = ((V + 127) // 128) * 128    # pad vocab to full lanes (unmasked output stores)

    f32 = jnp.float32
    feats_p = jnp.zeros((Bp, Fdim), f32).at[:B].set(features.astype(f32))
    caps_p = jnp.zeros((Bp, T), captions.dtype).at[:B].set(captions)

    # Embedding lookup + time-major flatten (XLA glue outside the kernel).
    tgt = jnp.take(embed_w.astype(f32), caps_p, axis=0)            # (Bp, T, E)
    tgt_flat = jnp.transpose(tgt, (1, 0, 2)).reshape(T * Bp, E)    # (T*Bp, E)

    # Fused-gate re-layout, pre-transposed for x @ W; columns ordered i|f|g|o.
    flat_layers = []
    for (w_ih, w_hh, b_ih, b_hh) in lstm_layers:
        flat_layers += [jnp.asarray(w_ih, f32).T,                              # (in, 4H)
                        jnp.asarray(w_hh, f32).T,                              # (H, 4H)
                        (jnp.asarray(b_ih, f32)
                         + jnp.asarray(b_hh, f32)).reshape(1, 4 * H)]          # (1, 4H)

    w_out_p = jnp.zeros((H, Vp), f32).at[:, :V].set(jnp.asarray(w_out, f32).T)
    b_out_p = jnp.zeros((1, Vp), f32).at[0, :V].set(jnp.asarray(b_out, f32))

    logits_flat = pl.pallas_call(
        _make_decoder_kernel(L, B, Bp, T, H),
        out_shape=jax.ShapeDtypeStruct((T * Bp, Vp), f32),
        scratch_shapes=[pltpu.VMEM((T * Bp, H), f32)],             # h_top accumulator
    )(feats_p, jnp.asarray(w_init, f32).T, jnp.asarray(b_init, f32).reshape(1, E),
      jnp.asarray(gamma, f32).reshape(1, E), jnp.asarray(beta, f32).reshape(1, E),
      tgt_flat, *flat_layers, w_out_p, b_out_p)

    logits = logits_flat.reshape(T, Bp, Vp)[:, :B, :V]             # drop padding
    return jnp.transpose(logits, (1, 0, 2))                        # (B, T, V)


# ----------------------------------------------------------------------------
# Pure-JAX reference (mirrors the PyTorch forward, high-precision dots).
# ----------------------------------------------------------------------------
def _reference_forward(features, captions, params, hidden_size):
    (w_init, b_init, gamma, beta, embed_w, lstm_layers, w_out, b_out) = params
    H = hidden_size
    hi = jax.lax.Precision.HIGHEST
    B = features.shape[0]
    T = captions.shape[1]
    L = len(lstm_layers)

    x0 = jnp.dot(features, w_init.T, precision=hi) + b_init
    mean = jnp.mean(x0, axis=0, keepdims=True)
    var = jnp.mean((x0 - mean) ** 2, axis=0, keepdims=True)        # biased (train mode)
    feats = (x0 - mean) / jnp.sqrt(var + 1e-5) * gamma + beta
    tgt = embed_w[captions]                                        # (B, T, E)

    h = [jnp.zeros((B, H), jnp.float32) for _ in range(L)]
    c = [jnp.zeros((B, H), jnp.float32) for _ in range(L)]
    logits = []
    for step in range(-1, T):
        x = feats if step == -1 else tgt[:, step]
        for l, (w_ih, w_hh, b_ih, b_hh) in enumerate(lstm_layers):
            gates = (jnp.dot(x, w_ih.T, precision=hi) + b_ih
                     + jnp.dot(h[l], w_hh.T, precision=hi) + b_hh)
            i_g = jax.nn.sigmoid(gates[:, 0:H])
            f_g = jax.nn.sigmoid(gates[:, H:2 * H])
            g_g = jnp.tanh(gates[:, 2 * H:3 * H])
            o_g = jax.nn.sigmoid(gates[:, 3 * H:4 * H])
            c[l] = f_g * c[l] + i_g * g_g
            h[l] = o_g * jnp.tanh(c[l])
            x = h[l]
        if step > -1:
            logits.append(jnp.dot(x, w_out.T, precision=hi) + b_out)
    return jnp.stack(logits, axis=1)                               # (B, T, V)


if __name__ == "__main__":
    # Hyper-parameters (small, consistent with the module's __init__)
    feature_size, embed_size, hidden_size, vocab_size, num_layers = 48, 32, 32, 64, 2
    B, T = 4, 8

    key = jax.random.PRNGKey(0)
    ks = list(jax.random.split(key, 16))

    def u(k, shape, scale=0.1):
        return jax.random.uniform(k, shape, jnp.float32, -1.0, 1.0) * scale

    # Deterministic synthetic parameters in native PyTorch layouts.
    w_init = u(ks[0], (embed_size, feature_size))
    b_init = u(ks[1], (embed_size,))
    gamma = jnp.ones((embed_size,), jnp.float32)       # BatchNorm1d weight
    beta = jnp.zeros((embed_size,), jnp.float32)       # BatchNorm1d bias
    embed_w = u(ks[2], (vocab_size, embed_size), 1.0)

    lstm_layers = []
    kidx = 3
    for l in range(num_layers):
        in_dim = embed_size if l == 0 else hidden_size
        w_ih = u(ks[kidx], (4 * hidden_size, in_dim)); kidx += 1
        w_hh = u(ks[kidx], (4 * hidden_size, hidden_size)); kidx += 1
        b_ih = u(ks[kidx], (4 * hidden_size,)); kidx += 1
        b_hh = u(ks[kidx], (4 * hidden_size,)); kidx += 1
        lstm_layers.append((w_ih, w_hh, b_ih, b_hh))

    w_out = u(ks[kidx], (vocab_size, hidden_size)); kidx += 1
    b_out = u(ks[kidx], (vocab_size,)); kidx += 1

    features = jax.random.normal(ks[kidx], (B, feature_size), jnp.float32); kidx += 1
    captions = jax.random.randint(ks[kidx], (B, T), 0, vocab_size); kidx += 1

    params = (w_init, b_init, gamma, beta, embed_w, lstm_layers, w_out, b_out)

    logits = decoder_rnn_forward(features, captions, params, hidden_size, vocab_size)
    jax.block_until_ready(logits)
    assert logits.shape == (B, T, vocab_size), logits.shape
    assert bool(jnp.all(jnp.isfinite(logits)))

    ref = _reference_forward(features, captions, params, hidden_size)
    jax.block_until_ready(ref)
    max_err = float(jnp.max(jnp.abs(logits - ref)))
    assert bool(jnp.allclose(logits, ref, atol=1e-2, rtol=1e-2)), f"max_err={max_err}"

    print("KERNEL_OK")
</pallas_src>

<mosaic_0001>
module attributes {stable_mosaic.version = 11 : i64} {
  func.func @kernel(%arg0: memref<8x48xf32, #tpu.memory_space<vmem>>, %arg1: memref<48x32xf32, #tpu.memory_space<vmem>>, %arg2: memref<1x32xf32, #tpu.memory_space<vmem>>, %arg3: memref<1x32xf32, #tpu.memory_space<vmem>>, %arg4: memref<1x32xf32, #tpu.memory_space<vmem>>, %arg5: memref<64x32xf32, #tpu.memory_space<vmem>>, %arg6: memref<32x128xf32, #tpu.memory_space<vmem>>, %arg7: memref<32x128xf32, #tpu.memory_space<vmem>>, %arg8: memref<1x128xf32, #tpu.memory_space<vmem>>, %arg9: memref<32x128xf32, #tpu.memory_space<vmem>>, %arg10: memref<32x128xf32, #tpu.memory_space<vmem>>, %arg11: memref<1x128xf32, #tpu.memory_space<vmem>>, %arg12: memref<32x128xf32, #tpu.memory_space<vmem>>, %arg13: memref<1x128xf32, #tpu.memory_space<vmem>>, %arg14: memref<64x128xf32, #tpu.memory_space<vmem>>, %arg15: memref<64x32xf32, #tpu.memory_space<vmem>>) attributes {dimension_semantics = [], scalar_prefetch = 0 : i64, scratch_operands = 1 : i64, tpu.core_type = #tpu.core_type<tc>} {
    %c0 = arith.constant 0 : index
    %c0_0 = arith.constant 0 : index
    %0 = vector.load %arg0[%c0, %c0_0] : memref<8x48xf32, #tpu.memory_space<vmem>>, vector<8x48xf32>
    %c0_1 = arith.constant 0 : index
    %c0_2 = arith.constant 0 : index
    %1 = vector.load %arg1[%c0_1, %c0_2] : memref<48x32xf32, #tpu.memory_space<vmem>>, vector<48x32xf32>
    %cst = arith.constant dense<0.000000e+00> : vector<8x32xf32>
    %2 = tpu.matmul %0, %1, %cst {dimension_numbers = #tpu.dot_dimension_numbers<[1], [0], [0], [1], [0, 0, 1, 1], [], []>} : vector<8x48xf32>, vector<48x32xf32>, vector<8x32xf32> -> vector<8x32xf32>
    %c0_3 = arith.constant 0 : index
    %c0_4 = arith.constant 0 : index
    %3 = vector.load %arg2[%c0_3, %c0_4] : memref<1x32xf32, #tpu.memory_space<vmem>>, vector<1x32xf32>
    %4 = vector.broadcast %3 : vector<1x32xf32> to vector<8x32xf32>
    %5 = arith.addf %2, %4 : vector<8x32xf32>
    %6 = tpu.iota {dimensions = array<i32: 0>} : vector<8x1xi32>
    %c4_i32 = arith.constant 4 : i32
    %7 = vector.broadcast %c4_i32 : i32 to vector<8x1xi32>
    %8 = arith.cmpi slt, %6, %7 : vector<8x1xi32>
    %9 = arith.extui %8 : vector<8x1xi1> to vector<8x1xi32>
    %10 = arith.sitofp %9 : vector<8x1xi32> to vector<8x1xf32>
    %11 = vector.broadcast %10 : vector<8x1xf32> to vector<8x32xf32>
    %12 = arith.mulf %5, %11 : vector<8x32xf32>
    %cst_5 = arith.constant dense<0.000000e+00> : vector<32xf32>
    %13 = vector.multi_reduction <add>, %12, %cst_5 [0] : vector<8x32xf32> to vector<32xf32>
    %14 = vector.shape_cast %13 : vector<32xf32> to vector<1x32xf32>
    %cst_6 = arith.constant 2.500000e-01 : f32
    %15 = vector.broadcast %cst_6 : f32 to vector<1x32xf32>
    %16 = arith.mulf %14, %15 : vector<1x32xf32>
    %17 = vector.broadcast %16 : vector<1x32xf32> to vector<8x32xf32>
    %18 = arith.subf %5, %17 : vector<8x32xf32>
    %19 = arith.mulf %18, %18 : vector<8x32xf32>
    %20 = vector.broadcast %10 : vector<8x1xf32> to vector<8x32xf32>
    %21 = arith.mulf %19, %20 : vector<8x32xf32>
    %cst_7 = arith.constant dense<0.000000e+00> : vector<32xf32>
    %22 = vector.multi_reduction <add>, %21, %cst_7 [0] : vector<8x32xf32> to vector<32xf32>
    %23 = vector.shape_cast %22 : vector<32xf32> to vector<1x32xf32>
    %cst_8 = arith.constant 2.500000e-01 : f32
    %24 = vector.broadcast %cst_8 : f32 to vector<1x32xf32>
    %25 = arith.mulf %23, %24 : vector<1x32xf32>
    %cst_9 = arith.constant 9.99999974E-6 : f32
    %26 = vector.broadcast %cst_9 : f32 to vector<1x32xf32>
    %27 = arith.addf %25, %26 : vector<1x32xf32>
    %28 = math.rsqrt %27 : vector<1x32xf32>
    %29 = vector.broadcast %28 : vector<1x32xf32> to vector<8x32xf32>
    %30 = arith.mulf %18, %29 : vector<8x32xf32>
    %c0_10 = arith.constant 0 : index
    %c0_11 = arith.constant 0 : index
    %31 = vector.load %arg3[%c0_10, %c0_11] : memref<1x32xf32, #tpu.memory_space<vmem>>, vector<1x32xf32>
    %32 = vector.broadcast %31 : vector<1x32xf32> to vector<8x32xf32>
    %33 = arith.mulf %30, %32 : vector<8x32xf32>
    %c0_12 = arith.constant 0 : index
    %c0_13 = arith.constant 0 : index
    %34 = vector.load %arg4[%c0_12, %c0_13] : memref<1x32xf32, #tpu.memory_space<vmem>>, vector<1x32xf32>
    %35 = vector.broadcast %34 : vector<1x32xf32> to vector<8x32xf32>
    %36 = arith.addf %33, %35 : vector<8x32xf32>
    %c0_14 = arith.constant 0 : index
    %c0_15 = arith.constant 0 : index
    %37 = vector.load %arg6[%c0_14, %c0_15] : memref<32x128xf32, #tpu.memory_space<vmem>>, vector<32x128xf32>
    %c0_16 = arith.constant 0 : index
    %c0_17 = arith.constant 0 : index
    %38 = vector.load %arg8[%c0_16, %c0_17] : memref<1x128xf32, #tpu.memory_space<vmem>>, vector<1x128xf32>
    %cst_18 = arith.constant dense<0.000000e+00> : vector<8x128xf32>
    %39 = tpu.matmul %36, %37, %cst_18 {dimension_numbers = #tpu.dot_dimension_numbers<[1], [0], [0], [1], [0, 0, 1, 1], [], []>} : vector<8x32xf32>, vector<32x128xf32>, vector<8x128xf32> -> vector<8x128xf32>
    %40 = vector.broadcast %38 : vector<1x128xf32> to vector<8x128xf32>
    %41 = arith.addf %39, %40 : vector<8x128xf32>
    %c0_19 = arith.constant 0 : index
    %c0_20 = arith.constant 0 : index
    %42 = vector.load %arg5[%c0_19, %c0_20] : memref<64x32xf32, #tpu.memory_space<vmem>>, vector<64x32xf32>
    %cst_21 = arith.constant dense<0.000000e+00> : vector<64x128xf32>
    %43 = tpu.matmul %42, %37, %cst_21 {dimension_numbers = #tpu.dot_dimension_numbers<[1], [0], [0], [1], [0, 0, 1, 1], [], []>} : vector<64x32xf32>, vector<32x128xf32>, vector<64x128xf32> -> vector<64x128xf32>
    %44 = vector.broadcast %38 : vector<1x128xf32> to vector<64x128xf32>
    %45 = arith.addf %43, %44 : vector<64x128xf32>
    %c0_22 = arith.constant 0 : index
    %c0_23 = arith.constant 0 : index
    %46 = vector.load %arg7[%c0_22, %c0_23] : memref<32x128xf32, #tpu.memory_space<vmem>>, vector<32x128xf32>
    %c0_24 = arith.constant 0 : index
    %c0_25 = arith.constant 0 : index
    %47 = vector.load %arg10[%c0_24, %c0_25] : memref<32x128xf32, #tpu.memory_space<vmem>>, vector<32x128xf32>
    %c0_26 = arith.constant 0 : index
    %c0_27 = arith.constant 0 : index
    %48 = vector.load %arg9[%c0_26, %c0_27] : memref<32x128xf32, #tpu.memory_space<vmem>>, vector<32x128xf32>
    %c0_28 = arith.constant 0 : index
    %c0_29 = arith.constant 0 : index
    %49 = vector.load %arg11[%c0_28, %c0_29] : memref<1x128xf32, #tpu.memory_space<vmem>>, vector<1x128xf32>
    %50 = vector.shape_cast %49 : vector<1x128xf32> to vector<1x128xf32>
    %51 = vector.broadcast %50 : vector<1x128xf32> to vector<8x128xf32>
    %cst_30 = arith.constant 0.000000e+00 : f32
    %52 = vector.broadcast %cst_30 : f32 to vector<8x32xf32>
    %cst_31 = arith.constant 0.000000e+00 : f32
    %53 = vector.broadcast %cst_31 : f32 to vector<8x32xf32>
    %cst_32 = arith.constant 0.000000e+00 : f32
    %54 = vector.broadcast %cst_32 : f32 to vector<8x32xf32>
    %cst_33 = arith.constant 0.000000e+00 : f32
    %55 = vector.broadcast %cst_33 : f32 to vector<8x32xf32>
    %cst_34 = arith.constant dense<0.000000e+00> : vector<8x128xf32>
    %56 = tpu.matmul %52, %46, %cst_34 {dimension_numbers = #tpu.dot_dimension_numbers<[1], [0], [0], [1], [0, 0, 1, 1], [], []>} : vector<8x32xf32>, vector<32x128xf32>, vector<8x128xf32> -> vector<8x128xf32>
    %57 = arith.addf %41, %56 : vector<8x128xf32>
    %58 = vector.extract_strided_slice %57 {offsets = [0, 0], sizes = [8, 32], strides = [1, 1]} : vector<8x128xf32> to vector<8x32xf32>
    %59 = arith.negf %58 : vector<8x32xf32>
    %60 = math.exp %59 : vector<8x32xf32>
    %cst_35 = arith.constant 1.000000e+00 : f32
    %61 = vector.broadcast %cst_35 : f32 to vector<8x32xf32>
    %62 = arith.addf %61, %60 : vector<8x32xf32>
    %63 = arith.divf %61, %62 : vector<8x32xf32>
    %64 = vector.extract_strided_slice %57 {offsets = [0, 32], sizes = [8, 32], strides = [1, 1]} : vector<8x128xf32> to vector<8x32xf32>
    %65 = arith.negf %64 : vector<8x32xf32>
    %66 = math.exp %65 : vector<8x32xf32>
    %cst_36 = arith.constant 1.000000e+00 : f32
    %67 = vector.broadcast %cst_36 : f32 to vector<8x32xf32>
    %68 = arith.addf %67, %66 : vector<8x32xf32>
    %69 = arith.divf %67, %68 : vector<8x32xf32>
    %70 = vector.extract_strided_slice %57 {offsets = [0, 64], sizes = [8, 32], strides = [1, 1]} : vector<8x128xf32> to vector<8x32xf32>
    %71 = math.tanh %70 : vector<8x32xf32>
    %72 = vector.extract_strided_slice %57 {offsets = [0, 96], sizes = [8, 32], strides = [1, 1]} : vector<8x128xf32> to vector<8x32xf32>
    %73 = arith.negf %72 : vector<8x32xf32>
    %74 = math.exp %73 : vector<8x32xf32>
    %cst_37 = arith.constant 1.000000e+00 : f32
    %75 = vector.broadcast %cst_37 : f32 to vector<8x32xf32>
    %76 = arith.addf %75, %74 : vector<8x32xf32>
    %77 = arith.divf %75, %76 : vector<8x32xf32>
    %78 = arith.mulf %69, %54 : vector<8x32xf32>
    %79 = arith.mulf %63, %71 : vector<8x32xf32>
    %80 = arith.addf %78, %79 : vector<8x32xf32>
    %81 = math.tanh %80 : vector<8x32xf32>
    %82 = arith.mulf %77, %81 : vector<8x32xf32>
    %cst_38 = arith.constant dense<0.000000e+00> : vector<8x128xf32>
    %83 = tpu.matmul %82, %48, %cst_38 {dimension_numbers = #tpu.dot_dimension_numbers<[1], [0], [0], [1], [0, 0, 1, 1], [], []>} : vector<8x32xf32>, vector<32x128xf32>, vector<8x128xf32> -> vector<8x128xf32>
    %cst_39 = arith.constant dense<0.000000e+00> : vector<8x128xf32>
    %84 = tpu.matmul %53, %47, %cst_39 {dimension_numbers = #tpu.dot_dimension_numbers<[1], [0], [0], [1], [0, 0, 1, 1], [], []>} : vector<8x32xf32>, vector<32x128xf32>, vector<8x128xf32> -> vector<8x128xf32>
    %85 = arith.addf %83, %84 : vector<8x128xf32>
    %86 = arith.addf %85, %51 : vector<8x128xf32>
    %87 = vector.extract_strided_slice %86 {offsets = [0, 0], sizes = [8, 32], strides = [1, 1]} : vector<8x128xf32> to vector<8x32xf32>
    %88 = arith.negf %87 : vector<8x32xf32>
    %89 = math.exp %88 : vector<8x32xf32>
    %cst_40 = arith.constant 1.000000e+00 : f32
    %90 = vector.broadcast %cst_40 : f32 to vector<8x32xf32>
    %91 = arith.addf %90, %89 : vector<8x32xf32>
    %92 = arith.divf %90, %91 : vector<8x32xf32>
    %93 = vector.extract_strided_slice %86 {offsets = [0, 32], sizes = [8, 32], strides = [1, 1]} : vector<8x128xf32> to vector<8x32xf32>
    %94 = arith.negf %93 : vector<8x32xf32>
    %95 = math.exp %94 : vector<8x32xf32>
    %cst_41 = arith.constant 1.000000e+00 : f32
    %96 = vector.broadcast %cst_41 : f32 to vector<8x32xf32>
    %97 = arith.addf %96, %95 : vector<8x32xf32>
    %98 = arith.divf %96, %97 : vector<8x32xf32>
    %99 = vector.extract_strided_slice %86 {offsets = [0, 64], sizes = [8, 32], strides = [1, 1]} : vector<8x128xf32> to vector<8x32xf32>
    %100 = math.tanh %99 : vector<8x32xf32>
    %101 = vector.extract_strided_slice %86 {offsets = [0, 96], sizes = [8, 32], strides = [1, 1]} : vector<8x128xf32> to vector<8x32xf32>
    %102 = arith.negf %101 : vector<8x32xf32>
    %103 = math.exp %102 : vector<8x32xf32>
    %cst_42 = arith.constant 1.000000e+00 : f32
    %104 = vector.broadcast %cst_42 : f32 to vector<8x32xf32>
    %105 = arith.addf %104, %103 : vector<8x32xf32>
    %106 = arith.divf %104, %105 : vector<8x32xf32>
    %107 = arith.mulf %98, %55 : vector<8x32xf32>
    %108 = arith.mulf %92, %100 : vector<8x32xf32>
    %109 = arith.addf %107, %108 : vector<8x32xf32>
    %110 = math.tanh %109 : vector<8x32xf32>
    %111 = arith.mulf %106, %110 : vector<8x32xf32>
    %112 = vector.extract_strided_slice %45 {offsets = [0, 0], sizes = [8, 128], strides = [1, 1]} : vector<64x128xf32> to vector<8x128xf32>
    %cst_43 = arith.constant dense<0.000000e+00> : vector<8x128xf32>
    %113 = tpu.matmul %82, %46, %cst_43 {dimension_numbers = #tpu.dot_dimension_numbers<[1], [0], [0], [1], [0, 0, 1, 1], [], []>} : vector<8x32xf32>, vector<32x128xf32>, vector<8x128xf32> -> vector<8x128xf32>
    %114 = arith.addf %112, %113 : vector<8x128xf32>
    %115 = vector.extract_strided_slice %114 {offsets = [0, 0], sizes = [8, 32], strides = [1, 1]} : vector<8x128xf32> to vector<8x32xf32>
    %116 = arith.negf %115 : vector<8x32xf32>
    %117 = math.exp %116 : vector<8x32xf32>
    %cst_44 = arith.constant 1.000000e+00 : f32
    %118 = vector.broadcast %cst_44 : f32 to vector<8x32xf32>
    %119 = arith.addf %118, %117 : vector<8x32xf32>
    %120 = arith.divf %118, %119 : vector<8x32xf32>
    %121 = vector.extract_strided_slice %114 {offsets = [0, 32], sizes = [8, 32], strides = [1, 1]} : vector<8x128xf32> to vector<8x32xf32>
    %122 = arith.negf %121 : vector<8x32xf32>
    %123 = math.exp %122 : vector<8x32xf32>
    %cst_45 = arith.constant 1.000000e+00 : f32
    %124 = vector.broadcast %cst_45 : f32 to vector<8x32xf32>
    %125 = arith.addf %124, %123 : vector<8x32xf32>
    %126 = arith.divf %124, %125 : vector<8x32xf32>
    %127 = vector.extract_strided_slice %114 {offsets = [0, 64], sizes = [8, 32], strides = [1, 1]} : vector<8x128xf32> to vector<8x32xf32>
    %128 = math.tanh %127 : vector<8x32xf32>
    %129 = vector.extract_strided_slice %114 {offsets = [0, 96], sizes = [8, 32], strides = [1, 1]} : vector<8x128xf32> to vector<8x32xf32>
    %130 = arith.negf %129 : vector<8x32xf32>
    %131 = math.exp %130 : vector<8x32xf32>
    %cst_46 = arith.constant 1.000000e+00 : f32
    %132 = vector.broadcast %cst_46 : f32 to vector<8x32xf32>
    %133 = arith.addf %132, %131 : vector<8x32xf32>
    %134 = arith.divf %132, %133 : vector<8x32xf32>
    %135 = arith.mulf %126, %80 : vector<8x32xf32>
    %136 = arith.mulf %120, %128 : vector<8x32xf32>
    %137 = arith.addf %135, %136 : vector<8x32xf32>
    %138 = math.tanh %137 : vector<8x32xf32>
    %139 = arith.mulf %134, %138 : vector<8x32xf32>
    %cst_47 = arith.constant dense<0.000000e+00> : vector<8x128xf32>
    %140 = tpu.matmul %139, %48, %cst_47 {dimension_numbers = #tpu.dot_dimension_numbers<[1], [0], [0], [1], [0, 0, 1, 1], [], []>} : vector<8x32xf32>, vector<32x128xf32>, vector<8x128xf32> -> vector<8x128xf32>
    %cst_48 = arith.constant dense<0.000000e+00> : vector<8x128xf32>
    %141 = tpu.matmul %111, %47, %cst_48 {dimension_numbers = #tpu.dot_dimension_numbers<[1], [0], [0], [1], [0, 0, 1, 1], [], []>} : vector<8x32xf32>, vector<32x128xf32>, vector<8x128xf32> -> vector<8x128xf32>
    %142 = arith.addf %140, %141 : vector<8x128xf32>
    %143 = arith.addf %142, %51 : vector<8x128xf32>
    %144 = vector.extract_strided_slice %143 {offsets = [0, 0], sizes = [8, 32], strides = [1, 1]} : vector<8x128xf32> to vector<8x32xf32>
    %145 = arith.negf %144 : vector<8x32xf32>
    %146 = math.exp %145 : vector<8x32xf32>
    %cst_49 = arith.constant 1.000000e+00 : f32
    %147 = vector.broadcast %cst_49 : f32 to vector<8x32xf32>
    %148 = arith.addf %147, %146 : vector<8x32xf32>
    %149 = arith.divf %147, %148 : vector<8x32xf32>
    %150 = vector.extract_strided_slice %143 {offsets = [0, 32], sizes = [8, 32], strides = [1, 1]} : vector<8x128xf32> to vector<8x32xf32>
    %151 = arith.negf %150 : vector<8x32xf32>
    %152 = math.exp %151 : vector<8x32xf32>
    %cst_50 = arith.constant 1.000000e+00 : f32
    %153 = vector.broadcast %cst_50 : f32 to vector<8x32xf32>
    %154 = arith.addf %153, %152 : vector<8x32xf32>
    %155 = arith.divf %153, %154 : vector<8x32xf32>
    %156 = vector.extract_strided_slice %143 {offsets = [0, 64], sizes = [8, 32], strides = [1, 1]} : vector<8x128xf32> to vector<8x32xf32>
    %157 = math.tanh %156 : vector<8x32xf32>
    %158 = vector.extract_strided_slice %143 {offsets = [0, 96], sizes = [8, 32], strides = [1, 1]} : vector<8x128xf32> to vector<8x32xf32>
    %159 = arith.negf %158 : vector<8x32xf32>
    %160 = math.exp %159 : vector<8x32xf32>
    %cst_51 = arith.constant 1.000000e+00 : f32
    %161 = vector.broadcast %cst_51 : f32 to vector<8x32xf32>
    %162 = arith.addf %161, %160 : vector<8x32xf32>
    %163 = arith.divf %161, %162 : vector<8x32xf32>
    %164 = arith.mulf %155, %109 : vector<8x32xf32>
    %165 = arith.mulf %149, %157 : vector<8x32xf32>
    %166 = arith.addf %164, %165 : vector<8x32xf32>
    %167 = math.tanh %166 : vector<8x32xf32>
    %168 = arith.mulf %163, %167 : vector<8x32xf32>
    %c0_52 = arith.constant 0 : index
    %c0_53 = arith.constant 0 : index
    %169 = vector.load %arg15[%c0_52, %c0_53] : memref<64x32xf32, #tpu.memory_space<vmem>>, vector<8x32xf32>
    tpu.vector_store %arg15[%c0_52, %c0_53], %168 {strides = array<i32>} : memref<64x32xf32, #tpu.memory_space<vmem>>, vector<8x32xf32>,
    %170 = vector.extract_strided_slice %45 {offsets = [8, 0], sizes = [8, 128], strides = [1, 1]} : vector<64x128xf32> to vector<8x128xf32>
    %cst_54 = arith.constant dense<0.000000e+00> : vector<8x128xf32>
    %171 = tpu.matmul %139, %46, %cst_54 {dimension_numbers = #tpu.dot_dimension_numbers<[1], [0], [0], [1], [0, 0, 1, 1], [], []>} : vector<8x32xf32>, vector<32x128xf32>, vector<8x128xf32> -> vector<8x128xf32>
    %172 = arith.addf %170, %171 : vector<8x128xf32>
    %173 = vector.extract_strided_slice %172 {offsets = [0, 0], sizes = [8, 32], strides = [1, 1]} : vector<8x128xf32> to vector<8x32xf32>
    %174 = arith.negf %173 : vector<8x32xf32>
    %175 = math.exp %174 : vector<8x32xf32>
    %cst_55 = arith.constant 1.000000e+00 : f32
    %176 = vector.broadcast %cst_55 : f32 to vector<8x32xf32>
    %177 = arith.addf %176, %175 : vector<8x32xf32>
    %178 = arith.divf %176, %177 : vector<8x32xf32>
    %179 = vector.extract_strided_slice %172 {offsets = [0, 32], sizes = [8, 32], strides = [1, 1]} : vector<8x128xf32> to vector<8x32xf32>
    %180 = arith.negf %179 : vector<8x32xf32>
    %181 = math.exp %180 : vector<8x32xf32>
    %cst_56 = arith.constant 1.000000e+00 : f32
    %182 = vector.broadcast %cst_56 : f32 to vector<8x32xf32>
    %183 = arith.addf %182, %181 : vector<8x32xf32>
    %184 = arith.divf %182, %183 : vector<8x32xf32>
    %185 = vector.extract_strided_slice %172 {offsets = [0, 64], sizes = [8, 32], strides = [1, 1]} : vector<8x128xf32> to vector<8x32xf32>
    %186 = math.tanh %185 : vector<8x32xf32>
    %187 = vector.extract_strided_slice %172 {offsets = [0, 96], sizes = [8, 32], strides = [1, 1]} : vector<8x128xf32> to vector<8x32xf32>
    %188 = arith.negf %187 : vector<8x32xf32>
    %189 = math.exp %188 : vector<8x32xf32>
    %cst_57 = arith.constant 1.000000e+00 : f32
    %190 = vector.broadcast %cst_57 : f32 to vector<8x32xf32>
    %191 = arith.addf %190, %189 : vector<8x32xf32>
    %192 = arith.divf %190, %191 : vector<8x32xf32>
    %193 = arith.mulf %184, %137 : vector<8x32xf32>
    %194 = arith.mulf %178, %186 : vector<8x32xf32>
    %195 = arith.addf %193, %194 : vector<8x32xf32>
    %196 = math.tanh %195 : vector<8x32xf32>
    %197 = arith.mulf %192, %196 : vector<8x32xf32>
    %cst_58 = arith.constant dense<0.000000e+00> : vector<8x128xf32>
    %198 = tpu.matmul %197, %48, %cst_58 {dimension_numbers = #tpu.dot_dimension_numbers<[1], [0], [0], [1], [0, 0, 1, 1], [], []>} : vector<8x32xf32>, vector<32x128xf32>, vector<8x128xf32> -> vector<8x128xf32>
    %cst_59 = arith.constant dense<0.000000e+00> : vector<8x128xf32>
    %199 = tpu.matmul %168, %47, %cst_59 {dimension_numbers = #tpu.dot_dimension_numbers<[1], [0], [0], [1], [0, 0, 1, 1], [], []>} : vector<8x32xf32>, vector<32x128xf32>, vector<8x128xf32> -> vector<8x128xf32>
    %200 = arith.addf %198, %199 : vector<8x128xf32>
    %201 = arith.addf %200, %51 : vector<8x128xf32>
    %202 = vector.extract_strided_slice %201 {offsets = [0, 0], sizes = [8, 32], strides = [1, 1]} : vector<8x128xf32> to vector<8x32xf32>
    %203 = arith.negf %202 : vector<8x32xf32>
    %204 = math.exp %203 : vector<8x32xf32>
    %cst_60 = arith.constant 1.000000e+00 : f32
    %205 = vector.broadcast %cst_60 : f32 to vector<8x32xf32>
    %206 = arith.addf %205, %204 : vector<8x32xf32>
    %207 = arith.divf %205, %206 : vector<8x32xf32>
    %208 = vector.extract_strided_slice %201 {offsets = [0, 32], sizes = [8, 32], strides = [1, 1]} : vector<8x128xf32> to vector<8x32xf32>
    %209 = arith.negf %208 : vector<8x32xf32>
    %210 = math.exp %209 : vector<8x32xf32>
    %cst_61 = arith.constant 1.000000e+00 : f32
    %211 = vector.broadcast %cst_61 : f32 to vector<8x32xf32>
    %212 = arith.addf %211, %210 : vector<8x32xf32>
    %213 = arith.divf %211, %212 : vector<8x32xf32>
    %214 = vector.extract_strided_slice %201 {offsets = [0, 64], sizes = [8, 32], strides = [1, 1]} : vector<8x128xf32> to vector<8x32xf32>
    %215 = math.tanh %214 : vector<8x32xf32>
    %216 = vector.extract_strided_slice %201 {offsets = [0, 96], sizes = [8, 32], strides = [1, 1]} : vector<8x128xf32> to vector<8x32xf32>
    %217 = arith.negf %216 : vector<8x32xf32>
    %218 = math.exp %217 : vector<8x32xf32>
    %cst_62 = arith.constant 1.000000e+00 : f32
    %219 = vector.broadcast %cst_62 : f32 to vector<8x32xf32>
    %220 = arith.addf %219, %218 : vector<8x32xf32>
    %221 = arith.divf %219, %220 : vector<8x32xf32>
    %222 = arith.mulf %213, %166 : vector<8x32xf32>
    %223 = arith.mulf %207, %215 : vector<8x32xf32>
    %224 = arith.addf %222, %223 : vector<8x32xf32>
    %225 = math.tanh %224 : vector<8x32xf32>
    %226 = arith.mulf %221, %225 : vector<8x32xf32>
    %c8 = arith.constant 8 : index
    %c0_63 = arith.constant 0 : index
    %227 = vector.load %arg15[%c8, %c0_63] : memref<64x32xf32, #tpu.memory_space<vmem>>, vector<8x32xf32>
    tpu.vector_store %arg15[%c8, %c0_63], %226 {strides = array<i32>} : memref<64x32xf32, #tpu.memory_space<vmem>>, vector<8x32xf32>,
    %228 = vector.extract_strided_slice %45 {offsets = [16, 0], sizes = [8, 128], strides = [1, 1]} : vector<64x128xf32> to vector<8x128xf32>
    %cst_64 = arith.constant dense<0.000000e+00> : vector<8x128xf32>
    %229 = tpu.matmul %197, %46, %cst_64 {dimension_numbers = #tpu.dot_dimension_numbers<[1], [0], [0], [1], [0, 0, 1, 1], [], []>} : vector<8x32xf32>, vector<32x128xf32>, vector<8x128xf32> -> vector<8x128xf32>
    %230 = arith.addf %228, %229 : vector<8x128xf32>
    %231 = vector.extract_strided_slice %230 {offsets = [0, 0], sizes = [8, 32], strides = [1, 1]} : vector<8x128xf32> to vector<8x32xf32>
    %232 = arith.negf %231 : vector<8x32xf32>
    %233 = math.exp %232 : vector<8x32xf32>
    %cst_65 = arith.constant 1.000000e+00 : f32
    %234 = vector.broadcast %cst_65 : f32 to vector<8x32xf32>
    %235 = arith.addf %234, %233 : vector<8x32xf32>
    %236 = arith.divf %234, %235 : vector<8x32xf32>
    %237 = vector.extract_strided_slice %230 {offsets = [0, 32], sizes = [8, 32], strides = [1, 1]} : vector<8x128xf32> to vector<8x32xf32>
    %238 = arith.negf %237 : vector<8x32xf32>
    %239 = math.exp %238 : vector<8x32xf32>
    %cst_66 = arith.constant 1.000000e+00 : f32
    %240 = vector.broadcast %cst_66 : f32 to vector<8x32xf32>
    %241 = arith.addf %240, %239 : vector<8x32xf32>
    %242 = arith.divf %240, %241 : vector<8x32xf32>
    %243 = vector.extract_strided_slice %230 {offsets = [0, 64], sizes = [8, 32], strides = [1, 1]} : vector<8x128xf32> to vector<8x32xf32>
    %244 = math.tanh %243 : vector<8x32xf32>
    %245 = vector.extract_strided_slice %230 {offsets = [0, 96], sizes = [8, 32], strides = [1, 1]} : vector<8x128xf32> to vector<8x32xf32>
    %246 = arith.negf %245 : vector<8x32xf32>
    %247 = math.exp %246 : vector<8x32xf32>
    %cst_67 = arith.constant 1.000000e+00 : f32
    %248 = vector.broadcast %cst_67 : f32 to vector<8x32xf32>
    %249 = arith.addf %248, %247 : vector<8x32xf32>
    %250 = arith.divf %248, %249 : vector<8x32xf32>
    %251 = arith.mulf %242, %195 : vector<8x32xf32>
    %252 = arith.mulf %236, %244 : vector<8x32xf32>
    %253 = arith.addf %251, %252 : vector<8x32xf32>
    %254 = math.tanh %253 : vector<8x32xf32>
    %255 = arith.mulf %250, %254 : vector<8x32xf32>
    %cst_68 = arith.constant dense<0.000000e+00> : vector<8x128xf32>
    %256 = tpu.matmul %255, %48, %cst_68 {dimension_numbers = #tpu.dot_dimension_numbers<[1], [0], [0], [1], [0, 0, 1, 1], [], []>} : vector<8x32xf32>, vector<32x128xf32>, vector<8x128xf32> -> vector<8x128xf32>
    %cst_69 = arith.constant dense<0.000000e+00> : vector<8x128xf32>
    %257 = tpu.matmul %226, %47, %cst_69 {dimension_numbers = #tpu.dot_dimension_numbers<[1], [0], [0], [1], [0, 0, 1, 1], [], []>} : vector<8x32xf32>, vector<32x128xf32>, vector<8x128xf32> -> vector<8x128xf32>
    %258 = arith.addf %256, %257 : vector<8x128xf32>
    %259 = arith.addf %258, %51 : vector<8x128xf32>
    %260 = vector.extract_strided_slice %259 {offsets = [0, 0], sizes = [8, 32], strides = [1, 1]} : vector<8x128xf32> to vector<8x32xf32>
    %261 = arith.negf %260 : vector<8x32xf32>
    %262 = math.exp %261 : vector<8x32xf32>
    %cst_70 = arith.constant 1.000000e+00 : f32
    %263 = vector.broadcast %cst_70 : f32 to vector<8x32xf32>
    %264 = arith.addf %263, %262 : vector<8x32xf32>
    %265 = arith.divf %263, %264 : vector<8x32xf32>
    %266 = vector.extract_strided_slice %259 {offsets = [0, 32], sizes = [8, 32], strides = [1, 1]} : vector<8x128xf32> to vector<8x32xf32>
    %267 = arith.negf %266 : vector<8x32xf32>
    %268 = math.exp %267 : vector<8x32xf32>
    %cst_71 = arith.constant 1.000000e+00 : f32
    %269 = vector.broadcast %cst_71 : f32 to vector<8x32xf32>
    %270 = arith.addf %269, %268 : vector<8x32xf32>
    %271 = arith.divf %269, %270 : vector<8x32xf32>
    %272 = vector.extract_strided_slice %259 {offsets = [0, 64], sizes = [8, 32], strides = [1, 1]} : vector<8x128xf32> to vector<8x32xf32>
    %273 = math.tanh %272 : vector<8x32xf32>
    %274 = vector.extract_strided_slice %259 {offsets = [0, 96], sizes = [8, 32], strides = [1, 1]} : vector<8x128xf32> to vector<8x32xf32>
    %275 = arith.negf %274 : vector<8x32xf32>
    %276 = math.exp %275 : vector<8x32xf32>
    %cst_72 = arith.constant 1.000000e+00 : f32
    %277 = vector.broadcast %cst_72 : f32 to vector<8x32xf32>
    %278 = arith.addf %277, %276 : vector<8x32xf32>
    %279 = arith.divf %277, %278 : vector<8x32xf32>
    %280 = arith.mulf %271, %224 : vector<8x32xf32>
    %281 = arith.mulf %265, %273 : vector<8x32xf32>
    %282 = arith.addf %280, %281 : vector<8x32xf32>
    %283 = math.tanh %282 : vector<8x32xf32>
    %284 = arith.mulf %279, %283 : vector<8x32xf32>
    %c16 = arith.constant 16 : index
    %c0_73 = arith.constant 0 : index
    %285 = vector.load %arg15[%c16, %c0_73] : memref<64x32xf32, #tpu.memory_space<vmem>>, vector<8x32xf32>
    tpu.vector_store %arg15[%c16, %c0_73], %284 {strides = array<i32>} : memref<64x32xf32, #tpu.memory_space<vmem>>, vector<8x32xf32>,
    %286 = vector.extract_strided_slice %45 {offsets = [24, 0], sizes = [8, 128], strides = [1, 1]} : vector<64x128xf32> to vector<8x128xf32>
    %cst_74 = arith.constant dense<0.000000e+00> : vector<8x128xf32>
    %287 = tpu.matmul %255, %46, %cst_74 {dimension_numbers = #tpu.dot_dimension_numbers<[1], [0], [0], [1], [0, 0, 1, 1], [], []>} : vector<8x32xf32>, vector<32x128xf32>, vector<8x128xf32> -> vector<8x128xf32>
    %288 = arith.addf %286, %287 : vector<8x128xf32>
    %289 = vector.extract_strided_slice %288 {offsets = [0, 0], sizes = [8, 32], strides = [1, 1]} : vector<8x128xf32> to vector<8x32xf32>
    %290 = arith.negf %289 : vector<8x32xf32>
    %291 = math.exp %290 : vector<8x32xf32>
    %cst_75 = arith.constant 1.000000e+00 : f32
    %292 = vector.broadcast %cst_75 : f32 to vector<8x32xf32>
    %293 = arith.addf %292, %291 : vector<8x32xf32>
    %294 = arith.divf %292, %293 : vector<8x32xf32>
    %295 = vector.extract_strided_slice %288 {offsets = [0, 32], sizes = [8, 32], strides = [1, 1]} : vector<8x128xf32> to vector<8x32xf32>
    %296 = arith.negf %295 : vector<8x32xf32>
    %297 = math.exp %296 : vector<8x32xf32>
    %cst_76 = arith.constant 1.000000e+00 : f32
    %298 = vector.broadcast %cst_76 : f32 to vector<8x32xf32>
    %299 = arith.addf %298, %297 : vector<8x32xf32>
    %300 = arith.divf %298, %299 : vector<8x32xf32>
    %301 = vector.extract_strided_slice %288 {offsets = [0, 64], sizes = [8, 32], strides = [1, 1]} : vector<8x128xf32> to vector<8x32xf32>
    %302 = math.tanh %301 : vector<8x32xf32>
    %303 = vector.extract_strided_slice %288 {offsets = [0, 96], sizes = [8, 32], strides = [1, 1]} : vector<8x128xf32> to vector<8x32xf32>
    %304 = arith.negf %303 : vector<8x32xf32>
    %305 = math.exp %304 : vector<8x32xf32>
    %cst_77 = arith.constant 1.000000e+00 : f32
    %306 = vector.broadcast %cst_77 : f32 to vector<8x32xf32>
    %307 = arith.addf %306, %305 : vector<8x32xf32>
    %308 = arith.divf %306, %307 : vector<8x32xf32>
    %309 = arith.mulf %300, %253 : vector<8x32xf32>
    %310 = arith.mulf %294, %302 : vector<8x32xf32>
    %311 = arith.addf %309, %310 : vector<8x32xf32>
    %312 = math.tanh %311 : vector<8x32xf32>
    %313 = arith.mulf %308, %312 : vector<8x32xf32>
    %cst_78 = arith.constant dense<0.000000e+00> : vector<8x128xf32>
    %314 = tpu.matmul %313, %48, %cst_78 {dimension_numbers = #tpu.dot_dimension_numbers<[1], [0], [0], [1], [0, 0, 1, 1], [], []>} : vector<8x32xf32>, vector<32x128xf32>, vector<8x128xf32> -> vector<8x128xf32>
    %cst_79 = arith.constant dense<0.000000e+00> : vector<8x128xf32>
    %315 = tpu.matmul %284, %47, %cst_79 {dimension_numbers = #tpu.dot_dimension_numbers<[1], [0], [0], [1], [0, 0, 1, 1], [], []>} : vector<8x32xf32>, vector<32x128xf32>, vector<8x128xf32> -> vector<8x128xf32>
    %316 = arith.addf %314, %315 : vector<8x128xf32>
    %317 = arith.addf %316, %51 : vector<8x128xf32>
    %318 = vector.extract_strided_slice %317 {offsets = [0, 0], sizes = [8, 32], strides = [1, 1]} : vector<8x128xf32> to vector<8x32xf32>
    %319 = arith.negf %318 : vector<8x32xf32>
    %320 = math.exp %319 : vector<8x32xf32>
    %cst_80 = arith.constant 1.000000e+00 : f32
    %321 = vector.broadcast %cst_80 : f32 to vector<8x32xf32>
    %322 = arith.addf %321, %320 : vector<8x32xf32>
    %323 = arith.divf %321, %322 : vector<8x32xf32>
    %324 = vector.extract_strided_slice %317 {offsets = [0, 32], sizes = [8, 32], strides = [1, 1]} : vector<8x128xf32> to vector<8x32xf32>
    %325 = arith.negf %324 : vector<8x32xf32>
    %326 = math.exp %325 : vector<8x32xf32>
    %cst_81 = arith.constant 1.000000e+00 : f32
    %327 = vector.broadcast %cst_81 : f32 to vector<8x32xf32>
    %328 = arith.addf %327, %326 : vector<8x32xf32>
    %329 = arith.divf %327, %328 : vector<8x32xf32>
    %330 = vector.extract_strided_slice %317 {offsets = [0, 64], sizes = [8, 32], strides = [1, 1]} : vector<8x128xf32> to vector<8x32xf32>
    %331 = math.tanh %330 : vector<8x32xf32>
    %332 = vector.extract_strided_slice %317 {offsets = [0, 96], sizes = [8, 32], strides = [1, 1]} : vector<8x128xf32> to vector<8x32xf32>
    %333 = arith.negf %332 : vector<8x32xf32>
    %334 = math.exp %333 : vector<8x32xf32>
    %cst_82 = arith.constant 1.000000e+00 : f32
    %335 = vector.broadcast %cst_82 : f32 to vector<8x32xf32>
    %336 = arith.addf %335, %334 : vector<8x32xf32>
    %337 = arith.divf %335, %336 : vector<8x32xf32>
    %338 = arith.mulf %329, %282 : vector<8x32xf32>
    %339 = arith.mulf %323, %331 : vector<8x32xf32>
    %340 = arith.addf %338, %339 : vector<8x32xf32>
    %341 = math.tanh %340 : vector<8x32xf32>
    %342 = arith.mulf %337, %341 : vector<8x32xf32>
    %c24 = arith.constant 24 : index
    %c0_83 = arith.constant 0 : index
    %343 = vector.load %arg15[%c24, %c0_83] : memref<64x32xf32, #tpu.memory_space<vmem>>, vector<8x32xf32>
    tpu.vector_store %arg15[%c24, %c0_83], %342 {strides = array<i32>} : memref<64x32xf32, #tpu.memory_space<vmem>>, vector<8x32xf32>,
    %344 = vector.extract_strided_slice %45 {offsets = [32, 0], sizes = [8, 128], strides = [1, 1]} : vector<64x128xf32> to vector<8x128xf32>
    %cst_84 = arith.constant dense<0.000000e+00> : vector<8x128xf32>
    %345 = tpu.matmul %313, %46, %cst_84 {dimension_numbers = #tpu.dot_dimension_numbers<[1], [0], [0], [1], [0, 0, 1, 1], [], []>} : vector<8x32xf32>, vector<32x128xf32>, vector<8x128xf32> -> vector<8x128xf32>
    %346 = arith.addf %344, %345 : vector<8x128xf32>
    %347 = vector.extract_strided_slice %346 {offsets = [0, 0], sizes = [8, 32], strides = [1, 1]} : vector<8x128xf32> to vector<8x32xf32>
    %348 = arith.negf %347 : vector<8x32xf32>
    %349 = math.exp %348 : vector<8x32xf32>
    %cst_85 = arith.constant 1.000000e+00 : f32
    %350 = vector.broadcast %cst_85 : f32 to vector<8x32xf32>
    %351 = arith.addf %350, %349 : vector<8x32xf32>
    %352 = arith.divf %350, %351 : vector<8x32xf32>
    %353 = vector.extract_strided_slice %346 {offsets = [0, 32], sizes = [8, 32], strides = [1, 1]} : vector<8x128xf32> to vector<8x32xf32>
    %354 = arith.negf %353 : vector<8x32xf32>
    %355 = math.exp %354 : vector<8x32xf32>
    %cst_86 = arith.constant 1.000000e+00 : f32
    %356 = vector.broadcast %cst_86 : f32 to vector<8x32xf32>
    %357 = arith.addf %356, %355 : vector<8x32xf32>
    %358 = arith.divf %356, %357 : vector<8x32xf32>
    %359 = vector.extract_strided_slice %346 {offsets = [0, 64], sizes = [8, 32], strides = [1, 1]} : vector<8x128xf32> to vector<8x32xf32>
    %360 = math.tanh %359 : vector<8x32xf32>
    %361 = vector.extract_strided_slice %346 {offsets = [0, 96], sizes = [8, 32], strides = [1, 1]} : vector<8x128xf32> to vector<8x32xf32>
    %362 = arith.negf %361 : vector<8x32xf32>
    %363 = math.exp %362 : vector<8x32xf32>
    %cst_87 = arith.constant 1.000000e+00 : f32
    %364 = vector.broadcast %cst_87 : f32 to vector<8x32xf32>
    %365 = arith.addf %364, %363 : vector<8x32xf32>
    %366 = arith.divf %364, %365 : vector<8x32xf32>
    %367 = arith.mulf %358, %311 : vector<8x32xf32>
    %368 = arith.mulf %352, %360 : vector<8x32xf32>
    %369 = arith.addf %367, %368 : vector<8x32xf32>
    %370 = math.tanh %369 : vector<8x32xf32>
    %371 = arith.mulf %366, %370 : vector<8x32xf32>
    %cst_88 = arith.constant dense<0.000000e+00> : vector<8x128xf32>
    %372 = tpu.matmul %371, %48, %cst_88 {dimension_numbers = #tpu.dot_dimension_numbers<[1], [0], [0], [1], [0, 0, 1, 1], [], []>} : vector<8x32xf32>, vector<32x128xf32>, vector<8x128xf32> -> vector<8x128xf32>
    %cst_89 = arith.constant dense<0.000000e+00> : vector<8x128xf32>
    %373 = tpu.matmul %342, %47, %cst_89 {dimension_numbers = #tpu.dot_dimension_numbers<[1], [0], [0], [1], [0, 0, 1, 1], [], []>} : vector<8x32xf32>, vector<32x128xf32>, vector<8x128xf32> -> vector<8x128xf32>
    %374 = arith.addf %372, %373 : vector<8x128xf32>
    %375 = arith.addf %374, %51 : vector<8x128xf32>
    %376 = vector.extract_strided_slice %375 {offsets = [0, 0], sizes = [8, 32], strides = [1, 1]} : vector<8x128xf32> to vector<8x32xf32>
    %377 = arith.negf %376 : vector<8x32xf32>
    %378 = math.exp %377 : vector<8x32xf32>
    %cst_90 = arith.constant 1.000000e+00 : f32
    %379 = vector.broadcast %cst_90 : f32 to vector<8x32xf32>
    %380 = arith.addf %379, %378 : vector<8x32xf32>
    %381 = arith.divf %379, %380 : vector<8x32xf32>
    %382 = vector.extract_strided_slice %375 {offsets = [0, 32], sizes = [8, 32], strides = [1, 1]} : vector<8x128xf32> to vector<8x32xf32>
    %383 = arith.negf %382 : vector<8x32xf32>
    %384 = math.exp %383 : vector<8x32xf32>
    %cst_91 = arith.constant 1.000000e+00 : f32
    %385 = vector.broadcast %cst_91 : f32 to vector<8x32xf32>
    %386 = arith.addf %385, %384 : vector<8x32xf32>
    %387 = arith.divf %385, %386 : vector<8x32xf32>
    %388 = vector.extract_strided_slice %375 {offsets = [0, 64], sizes = [8, 32], strides = [1, 1]} : vector<8x128xf32> to vector<8x32xf32>
    %389 = math.tanh %388 : vector<8x32xf32>
    %390 = vector.extract_strided_slice %375 {offsets = [0, 96], sizes = [8, 32], strides = [1, 1]} : vector<8x128xf32> to vector<8x32xf32>
    %391 = arith.negf %390 : vector<8x32xf32>
    %392 = math.exp %391 : vector<8x32xf32>
    %cst_92 = arith.constant 1.000000e+00 : f32
    %393 = vector.broadcast %cst_92 : f32 to vector<8x32xf32>
    %394 = arith.addf %393, %392 : vector<8x32xf32>
    %395 = arith.divf %393, %394 : vector<8x32xf32>
    %396 = arith.mulf %387, %340 : vector<8x32xf32>
    %397 = arith.mulf %381, %389 : vector<8x32xf32>
    %398 = arith.addf %396, %397 : vector<8x32xf32>
    %399 = math.tanh %398 : vector<8x32xf32>
    %400 = arith.mulf %395, %399 : vector<8x32xf32>
    %c32 = arith.constant 32 : index
    %c0_93 = arith.constant 0 : index
    %401 = vector.load %arg15[%c32, %c0_93] : memref<64x32xf32, #tpu.memory_space<vmem>>, vector<8x32xf32>
    tpu.vector_store %arg15[%c32, %c0_93], %400 {strides = array<i32>} : memref<64x32xf32, #tpu.memory_space<vmem>>, vector<8x32xf32>,
    %402 = vector.extract_strided_slice %45 {offsets = [40, 0], sizes = [8, 128], strides = [1, 1]} : vector<64x128xf32> to vector<8x128xf32>
    %cst_94 = arith.constant dense<0.000000e+00> : vector<8x128xf32>
    %403 = tpu.matmul %371, %46, %cst_94 {dimension_numbers = #tpu.dot_dimension_numbers<[1], [0], [0], [1], [0, 0, 1, 1], [], []>} : vector<8x32xf32>, vector<32x128xf32>, vector<8x128xf32> -> vector<8x128xf32>
    %404 = arith.addf %402, %403 : vector<8x128xf32>
    %405 = vector.extract_strided_slice %404 {offsets = [0, 0], sizes = [8, 32], strides = [1, 1]} : vector<8x128xf32> to vector<8x32xf32>
    %406 = arith.negf %405 : vector<8x32xf32>
    %407 = math.exp %406 : vector<8x32xf32>
    %cst_95 = arith.constant 1.000000e+00 : f32
    %408 = vector.broadcast %cst_95 : f32 to vector<8x32xf32>
    %409 = arith.addf %408, %407 : vector<8x32xf32>
    %410 = arith.divf %408, %409 : vector<8x32xf32>
    %411 = vector.extract_strided_slice %404 {offsets = [0, 32], sizes = [8, 32], strides = [1, 1]} : vector<8x128xf32> to vector<8x32xf32>
    %412 = arith.negf %411 : vector<8x32xf32>
    %413 = math.exp %412 : vector<8x32xf32>
    %cst_96 = arith.constant 1.000000e+00 : f32
    %414 = vector.broadcast %cst_96 : f32 to vector<8x32xf32>
    %415 = arith.addf %414, %413 : vector<8x32xf32>
    %416 = arith.divf %414, %415 : vector<8x32xf32>
    %417 = vector.extract_strided_slice %404 {offsets = [0, 64], sizes = [8, 32], strides = [1, 1]} : vector<8x128xf32> to vector<8x32xf32>
    %418 = math.tanh %417 : vector<8x32xf32>
    %419 = vector.extract_strided_slice %404 {offsets = [0, 96], sizes = [8, 32], strides = [1, 1]} : vector<8x128xf32> to vector<8x32xf32>
    %420 = arith.negf %419 : vector<8x32xf32>
    %421 = math.exp %420 : vector<8x32xf32>
    %cst_97 = arith.constant 1.000000e+00 : f32
    %422 = vector.broadcast %cst_97 : f32 to vector<8x32xf32>
    %423 = arith.addf %422, %421 : vector<8x32xf32>
    %424 = arith.divf %422, %423 : vector<8x32xf32>
    %425 = arith.mulf %416, %369 : vector<8x32xf32>
    %426 = arith.mulf %410, %418 : vector<8x32xf32>
    %427 = arith.addf %425, %426 : vector<8x32xf32>
    %428 = math.tanh %427 : vector<8x32xf32>
    %429 = arith.mulf %424, %428 : vector<8x32xf32>
    %cst_98 = arith.constant dense<0.000000e+00> : vector<8x128xf32>
    %430 = tpu.matmul %429, %48, %cst_98 {dimension_numbers = #tpu.dot_dimension_numbers<[1], [0], [0], [1], [0, 0, 1, 1], [], []>} : vector<8x32xf32>, vector<32x128xf32>, vector<8x128xf32> -> vector<8x128xf32>
    %cst_99 = arith.constant dense<0.000000e+00> : vector<8x128xf32>
    %431 = tpu.matmul %400, %47, %cst_99 {dimension_numbers = #tpu.dot_dimension_numbers<[1], [0], [0], [1], [0, 0, 1, 1], [], []>} : vector<8x32xf32>, vector<32x128xf32>, vector<8x128xf32> -> vector<8x128xf32>
    %432 = arith.addf %430, %431 : vector<8x128xf32>
    %433 = arith.addf %432, %51 : vector<8x128xf32>
    %434 = vector.extract_strided_slice %433 {offsets = [0, 0], sizes = [8, 32], strides = [1, 1]} : vector<8x128xf32> to vector<8x32xf32>
    %435 = arith.negf %434 : vector<8x32xf32>
    %436 = math.exp %435 : vector<8x32xf32>
    %cst_100 = arith.constant 1.000000e+00 : f32
    %437 = vector.broadcast %cst_100 : f32 to vector<8x32xf32>
    %438 = arith.addf %437, %436 : vector<8x32xf32>
    %439 = arith.divf %437, %438 : vector<8x32xf32>
    %440 = vector.extract_strided_slice %433 {offsets = [0, 32], sizes = [8, 32], strides = [1, 1]} : vector<8x128xf32> to vector<8x32xf32>
    %441 = arith.negf %440 : vector<8x32xf32>
    %442 = math.exp %441 : vector<8x32xf32>
    %cst_101 = arith.constant 1.000000e+00 : f32
    %443 = vector.broadcast %cst_101 : f32 to vector<8x32xf32>
    %444 = arith.addf %443, %442 : vector<8x32xf32>
    %445 = arith.divf %443, %444 : vector<8x32xf32>
    %446 = vector.extract_strided_slice %433 {offsets = [0, 64], sizes = [8, 32], strides = [1, 1]} : vector<8x128xf32> to vector<8x32xf32>
    %447 = math.tanh %446 : vector<8x32xf32>
    %448 = vector.extract_strided_slice %433 {offsets = [0, 96], sizes = [8, 32], strides = [1, 1]} : vector<8x128xf32> to vector<8x32xf32>
    %449 = arith.negf %448 : vector<8x32xf32>
    %450 = math.exp %449 : vector<8x32xf32>
    %cst_102 = arith.constant 1.000000e+00 : f32
    %451 = vector.broadcast %cst_102 : f32 to vector<8x32xf32>
    %452 = arith.addf %451, %450 : vector<8x32xf32>
    %453 = arith.divf %451, %452 : vector<8x32xf32>
    %454 = arith.mulf %445, %398 : vector<8x32xf32>
    %455 = arith.mulf %439, %447 : vector<8x32xf32>
    %456 = arith.addf %454, %455 : vector<8x32xf32>
    %457 = math.tanh %456 : vector<8x32xf32>
    %458 = arith.mulf %453, %457 : vector<8x32xf32>
    %c40 = arith.constant 40 : index
    %c0_103 = arith.constant 0 : index
    %459 = vector.load %arg15[%c40, %c0_103] : memref<64x32xf32, #tpu.memory_space<vmem>>, vector<8x32xf32>
    tpu.vector_store %arg15[%c40, %c0_103], %458 {strides = array<i32>} : memref<64x32xf32, #tpu.memory_space<vmem>>, vector<8x32xf32>,
    %460 = vector.extract_strided_slice %45 {offsets = [48, 0], sizes = [8, 128], strides = [1, 1]} : vector<64x128xf32> to vector<8x128xf32>
    %cst_104 = arith.constant dense<0.000000e+00> : vector<8x128xf32>
    %461 = tpu.matmul %429, %46, %cst_104 {dimension_numbers = #tpu.dot_dimension_numbers<[1], [0], [0], [1], [0, 0, 1, 1], [], []>} : vector<8x32xf32>, vector<32x128xf32>, vector<8x128xf32> -> vector<8x128xf32>
    %462 = arith.addf %460, %461 : vector<8x128xf32>
    %463 = vector.extract_strided_slice %462 {offsets = [0, 0], sizes = [8, 32], strides = [1, 1]} : vector<8x128xf32> to vector<8x32xf32>
    %464 = arith.negf %463 : vector<8x32xf32>
    %465 = math.exp %464 : vector<8x32xf32>
    %cst_105 = arith.constant 1.000000e+00 : f32
    %466 = vector.broadcast %cst_105 : f32 to vector<8x32xf32>
    %467 = arith.addf %466, %465 : vector<8x32xf32>
    %468 = arith.divf %466, %467 : vector<8x32xf32>
    %469 = vector.extract_strided_slice %462 {offsets = [0, 32], sizes = [8, 32], strides = [1, 1]} : vector<8x128xf32> to vector<8x32xf32>
    %470 = arith.negf %469 : vector<8x32xf32>
    %471 = math.exp %470 : vector<8x32xf32>
    %cst_106 = arith.constant 1.000000e+00 : f32
    %472 = vector.broadcast %cst_106 : f32 to vector<8x32xf32>
    %473 = arith.addf %472, %471 : vector<8x32xf32>
    %474 = arith.divf %472, %473 : vector<8x32xf32>
    %475 = vector.extract_strided_slice %462 {offsets = [0, 64], sizes = [8, 32], strides = [1, 1]} : vector<8x128xf32> to vector<8x32xf32>
    %476 = math.tanh %475 : vector<8x32xf32>
    %477 = vector.extract_strided_slice %462 {offsets = [0, 96], sizes = [8, 32], strides = [1, 1]} : vector<8x128xf32> to vector<8x32xf32>
    %478 = arith.negf %477 : vector<8x32xf32>
    %479 = math.exp %478 : vector<8x32xf32>
    %cst_107 = arith.constant 1.000000e+00 : f32
    %480 = vector.broadcast %cst_107 : f32 to vector<8x32xf32>
    %481 = arith.addf %480, %479 : vector<8x32xf32>
    %482 = arith.divf %480, %481 : vector<8x32xf32>
    %483 = arith.mulf %474, %427 : vector<8x32xf32>
    %484 = arith.mulf %468, %476 : vector<8x32xf32>
    %485 = arith.addf %483, %484 : vector<8x32xf32>
    %486 = math.tanh %485 : vector<8x32xf32>
    %487 = arith.mulf %482, %486 : vector<8x32xf32>
    %cst_108 = arith.constant dense<0.000000e+00> : vector<8x128xf32>
    %488 = tpu.matmul %487, %48, %cst_108 {dimension_numbers = #tpu.dot_dimension_numbers<[1], [0], [0], [1], [0, 0, 1, 1], [], []>} : vector<8x32xf32>, vector<32x128xf32>, vector<8x128xf32> -> vector<8x128xf32>
    %cst_109 = arith.constant dense<0.000000e+00> : vector<8x128xf32>
    %489 = tpu.matmul %458, %47, %cst_109 {dimension_numbers = #tpu.dot_dimension_numbers<[1], [0], [0], [1], [0, 0, 1, 1], [], []>} : vector<8x32xf32>, vector<32x128xf32>, vector<8x128xf32> -> vector<8x128xf32>
    %490 = arith.addf %488, %489 : vector<8x128xf32>
    %491 = arith.addf %490, %51 : vector<8x128xf32>
    %492 = vector.extract_strided_slice %491 {offsets = [0, 0], sizes = [8, 32], strides = [1, 1]} : vector<8x128xf32> to vector<8x32xf32>
    %493 = arith.negf %492 : vector<8x32xf32>
    %494 = math.exp %493 : vector<8x32xf32>
    %cst_110 = arith.constant 1.000000e+00 : f32
    %495 = vector.broadcast %cst_110 : f32 to vector<8x32xf32>
    %496 = arith.addf %495, %494 : vector<8x32xf32>
    %497 = arith.divf %495, %496 : vector<8x32xf32>
    %498 = vector.extract_strided_slice %491 {offsets = [0, 32], sizes = [8, 32], strides = [1, 1]} : vector<8x128xf32> to vector<8x32xf32>
    %499 = arith.negf %498 : vector<8x32xf32>
    %500 = math.exp %499 : vector<8x32xf32>
    %cst_111 = arith.constant 1.000000e+00 : f32
    %501 = vector.broadcast %cst_111 : f32 to vector<8x32xf32>
    %502 = arith.addf %501, %500 : vector<8x32xf32>
    %503 = arith.divf %501, %502 : vector<8x32xf32>
    %504 = vector.extract_strided_slice %491 {offsets = [0, 64], sizes = [8, 32], strides = [1, 1]} : vector<8x128xf32> to vector<8x32xf32>
    %505 = math.tanh %504 : vector<8x32xf32>
    %506 = vector.extract_strided_slice %491 {offsets = [0, 96], sizes = [8, 32], strides = [1, 1]} : vector<8x128xf32> to vector<8x32xf32>
    %507 = arith.negf %506 : vector<8x32xf32>
    %508 = math.exp %507 : vector<8x32xf32>
    %cst_112 = arith.constant 1.000000e+00 : f32
    %509 = vector.broadcast %cst_112 : f32 to vector<8x32xf32>
    %510 = arith.addf %509, %508 : vector<8x32xf32>
    %511 = arith.divf %509, %510 : vector<8x32xf32>
    %512 = arith.mulf %503, %456 : vector<8x32xf32>
    %513 = arith.mulf %497, %505 : vector<8x32xf32>
    %514 = arith.addf %512, %513 : vector<8x32xf32>
    %515 = math.tanh %514 : vector<8x32xf32>
    %516 = arith.mulf %511, %515 : vector<8x32xf32>
    %c48 = arith.constant 48 : index
    %c0_113 = arith.constant 0 : index
    %517 = vector.load %arg15[%c48, %c0_113] : memref<64x32xf32, #tpu.memory_space<vmem>>, vector<8x32xf32>
    tpu.vector_store %arg15[%c48, %c0_113], %516 {strides = array<i32>} : memref<64x32xf32, #tpu.memory_space<vmem>>, vector<8x32xf32>,
    %518 = vector.extract_strided_slice %45 {offsets = [56, 0], sizes = [8, 128], strides = [1, 1]} : vector<64x128xf32> to vector<8x128xf32>
    %cst_114 = arith.constant dense<0.000000e+00> : vector<8x128xf32>
    %519 = tpu.matmul %487, %46, %cst_114 {dimension_numbers = #tpu.dot_dimension_numbers<[1], [0], [0], [1], [0, 0, 1, 1], [], []>} : vector<8x32xf32>, vector<32x128xf32>, vector<8x128xf32> -> vector<8x128xf32>
    %520 = arith.addf %518, %519 : vector<8x128xf32>
    %521 = vector.extract_strided_slice %520 {offsets = [0, 0], sizes = [8, 32], strides = [1, 1]} : vector<8x128xf32> to vector<8x32xf32>
    %522 = arith.negf %521 : vector<8x32xf32>
    %523 = math.exp %522 : vector<8x32xf32>
    %cst_115 = arith.constant 1.000000e+00 : f32
    %524 = vector.broadcast %cst_115 : f32 to vector<8x32xf32>
    %525 = arith.addf %524, %523 : vector<8x32xf32>
    %526 = arith.divf %524, %525 : vector<8x32xf32>
    %527 = vector.extract_strided_slice %520 {offsets = [0, 32], sizes = [8, 32], strides = [1, 1]} : vector<8x128xf32> to vector<8x32xf32>
    %528 = arith.negf %527 : vector<8x32xf32>
    %529 = math.exp %528 : vector<8x32xf32>
    %cst_116 = arith.constant 1.000000e+00 : f32
    %530 = vector.broadcast %cst_116 : f32 to vector<8x32xf32>
    %531 = arith.addf %530, %529 : vector<8x32xf32>
    %532 = arith.divf %530, %531 : vector<8x32xf32>
    %533 = vector.extract_strided_slice %520 {offsets = [0, 64], sizes = [8, 32], strides = [1, 1]} : vector<8x128xf32> to vector<8x32xf32>
    %534 = math.tanh %533 : vector<8x32xf32>
    %535 = vector.extract_strided_slice %520 {offsets = [0, 96], sizes = [8, 32], strides = [1, 1]} : vector<8x128xf32> to vector<8x32xf32>
    %536 = arith.negf %535 : vector<8x32xf32>
    %537 = math.exp %536 : vector<8x32xf32>
    %cst_117 = arith.constant 1.000000e+00 : f32
    %538 = vector.broadcast %cst_117 : f32 to vector<8x32xf32>
    %539 = arith.addf %538, %537 : vector<8x32xf32>
    %540 = arith.divf %538, %539 : vector<8x32xf32>
    %541 = arith.mulf %532, %485 : vector<8x32xf32>
    %542 = arith.mulf %526, %534 : vector<8x32xf32>
    %543 = arith.addf %541, %542 : vector<8x32xf32>
    %544 = math.tanh %543 : vector<8x32xf32>
    %545 = arith.mulf %540, %544 : vector<8x32xf32>
    %cst_118 = arith.constant dense<0.000000e+00> : vector<8x128xf32>
    %546 = tpu.matmul %545, %48, %cst_118 {dimension_numbers = #tpu.dot_dimension_numbers<[1], [0], [0], [1], [0, 0, 1, 1], [], []>} : vector<8x32xf32>, vector<32x128xf32>, vector<8x128xf32> -> vector<8x128xf32>
    %cst_119 = arith.constant dense<0.000000e+00> : vector<8x128xf32>
    %547 = tpu.matmul %516, %47, %cst_119 {dimension_numbers = #tpu.dot_dimension_numbers<[1], [0], [0], [1], [0, 0, 1, 1], [], []>} : vector<8x32xf32>, vector<32x128xf32>, vector<8x128xf32> -> vector<8x128xf32>
    %548 = arith.addf %546, %547 : vector<8x128xf32>
    %549 = arith.addf %548, %51 : vector<8x128xf32>
    %550 = vector.extract_strided_slice %549 {offsets = [0, 0], sizes = [8, 32], strides = [1, 1]} : vector<8x128xf32> to vector<8x32xf32>
    %551 = arith.negf %550 : vector<8x32xf32>
    %552 = math.exp %551 : vector<8x32xf32>
    %cst_120 = arith.constant 1.000000e+00 : f32
    %553 = vector.broadcast %cst_120 : f32 to vector<8x32xf32>
    %554 = arith.addf %553, %552 : vector<8x32xf32>
    %555 = arith.divf %553, %554 : vector<8x32xf32>
    %556 = vector.extract_strided_slice %549 {offsets = [0, 32], sizes = [8, 32], strides = [1, 1]} : vector<8x128xf32> to vector<8x32xf32>
    %557 = arith.negf %556 : vector<8x32xf32>
    %558 = math.exp %557 : vector<8x32xf32>
    %cst_121 = arith.constant 1.000000e+00 : f32
    %559 = vector.broadcast %cst_121 : f32 to vector<8x32xf32>
    %560 = arith.addf %559, %558 : vector<8x32xf32>
    %561 = arith.divf %559, %560 : vector<8x32xf32>
    %562 = vector.extract_strided_slice %549 {offsets = [0, 64], sizes = [8, 32], strides = [1, 1]} : vector<8x128xf32> to vector<8x32xf32>
    %563 = math.tanh %562 : vector<8x32xf32>
    %564 = vector.extract_strided_slice %549 {offsets = [0, 96], sizes = [8, 32], strides = [1, 1]} : vector<8x128xf32> to vector<8x32xf32>
    %565 = arith.negf %564 : vector<8x32xf32>
    %566 = math.exp %565 : vector<8x32xf32>
    %cst_122 = arith.constant 1.000000e+00 : f32
    %567 = vector.broadcast %cst_122 : f32 to vector<8x32xf32>
    %568 = arith.addf %567, %566 : vector<8x32xf32>
    %569 = arith.divf %567, %568 : vector<8x32xf32>
    %570 = arith.mulf %561, %514 : vector<8x32xf32>
    %571 = arith.mulf %555, %563 : vector<8x32xf32>
    %572 = arith.addf %570, %571 : vector<8x32xf32>
    %573 = math.tanh %572 : vector<8x32xf32>
    %574 = arith.mulf %569, %573 : vector<8x32xf32>
    %c56 = arith.constant 56 : index
    %c0_123 = arith.constant 0 : index
    %575 = vector.load %arg15[%c56, %c0_123] : memref<64x32xf32, #tpu.memory_space<vmem>>, vector<8x32xf32>
    tpu.vector_store %arg15[%c56, %c0_123], %574 {strides = array<i32>} : memref<64x32xf32, #tpu.memory_space<vmem>>, vector<8x32xf32>,
    %c0_124 = arith.constant 0 : index
    %c0_125 = arith.constant 0 : index
    %576 = vector.load %arg15[%c0_124, %c0_125] : memref<64x32xf32, #tpu.memory_space<vmem>>, vector<64x32xf32>
    %c0_126 = arith.constant 0 : index
    %c0_127 = arith.constant 0 : index
    %577 = vector.load %arg12[%c0_126, %c0_127] : memref<32x128xf32, #tpu.memory_space<vmem>>, vector<32x128xf32>
    %cst_128 = arith.constant dense<0.000000e+00> : vector<64x128xf32>
    %578 = tpu.matmul %576, %577, %cst_128 {dimension_numbers = #tpu.dot_dimension_numbers<[1], [0], [0], [1], [0, 0, 1, 1], [], []>} : vector<64x32xf32>, vector<32x128xf32>, vector<64x128xf32> -> vector<64x128xf32>
    %c0_129 = arith.constant 0 : index
    %c0_130 = arith.constant 0 : index
    %579 = vector.load %arg13[%c0_129, %c0_130] : memref<1x128xf32, #tpu.memory_space<vmem>>, vector<1x128xf32>
    %580 = vector.broadcast %579 : vector<1x128xf32> to vector<64x128xf32>
    %581 = arith.addf %578, %580 : vector<64x128xf32>
    %c0_131 = arith.constant 0 : index
    %c0_132 = arith.constant 0 : index
    %582 = vector.load %arg14[%c0_131, %c0_132] : memref<64x128xf32, #tpu.memory_space<vmem>>, vector<64x128xf32>
    tpu.vector_store %arg14[%c0_131, %c0_132], %581 {strides = array<i32>} : memref<64x128xf32, #tpu.memory_space<vmem>>, vector<64x128xf32>,
    return
  }
}

</mosaic_0001>

<bundles_post_ra>
// kernel: tpu_custom_call.1
= control target key start
LH: loop header
LB: loop body
LE: loop exit
PB: predicated region body
PF: predicated region fallthrough
CT: control target
= control target key end

     0   :  { %v3830_v1 = vmov 0.0   ;;  %vm3831_vm0 = vmmov 0   ;;  %s4637_s0 = inlined_call_operand.vmem [shape: f32[8,48], index: 0, kind: input, shape index: {}]   ;;  %s4638_s1 = inlined_call_operand.vmem [shape: f32[48,32], index: 1, kind: input, shape index: {}]   ;;  %s4639_s2 = inlined_call_operand.vmem [shape: f32[1,32], index: 2, kind: input, shape index: {}]   ;;  %s4640_s3 = inlined_call_operand.vmem [shape: f32[1,32], index: 3, kind: input, shape index: {}]   ;;  %s4641_s4 = inlined_call_operand.vmem [shape: f32[1,32], index: 4, kind: input, shape index: {}]   ;;  %s4642_s5 = inlined_call_operand.vmem [shape: f32[64,32], index: 5, kind: input, shape index: {}]   ;;  %s4643_s6 = inlined_call_operand.vmem [shape: f32[32,128], index: 6, kind: input, shape index: {}]   ;;  %s4644_s7 = inlined_call_operand.vmem [shape: f32[32,128], index: 7, kind: input, shape index: {}]   ;;  %s4645_s8 = inlined_call_operand.vmem [shape: f32[1,128], index: 8, kind: input, shape index: {}]   ;;  %s4646_s9 = inlined_call_operand.vmem [shape: f32[32,128], index: 9, kind: input, shape index: {}]   ;;  %s4647_s10 = inlined_call_operand.vmem [shape: f32[32,128], index: 10, kind: input, shape index: {}]   ;;  %s4648_s11 = inlined_call_operand.vmem [shape: f32[1,128], index: 11, kind: input, shape index: {}]   ;;  %s4649_s12 = inlined_call_operand.vmem [shape: f32[32,128], index: 12, kind: input, shape index: {}]   ;;  %s4650_s13 = inlined_call_operand.vmem [shape: f32[1,128], index: 13, kind: input, shape index: {}]   ;;  %s4651_s14 = inlined_call_operand.hbm [shape: f32[64,128], index: 14, kind: output, shape index: {}]  }
   0x1   :  { %v54_v0 = vld [vmem:[%s4638_s1 + $0x28] sm:$0xff]  ;;  %3279 = vmatprep.subr.mxu0 %v3830_v1  ;;  %v53_v2 = vld [vmem:[%s4638_s1 + $0x20] sm:$0xff]  ;;  %3291 = vmatprep.mubr.msk.f32.mxu0 %vm3831_vm0, %v3830_v1 }
   0x2   :  { %3280 = vmatpush3.msra.mxu0 %v54_v0  ;;  %3294 = vmatprep.subr.mxu1 %v3830_v1 }
   0x3   :  { %19 = vsyncpa [#allocation4], 0  ;;  %3281 = vmatprep.subr.mxu0 %v3830_v1  ;;  %v52_v3 = vld [vmem:[%s4638_s1 + $0x18] sm:$0xff]  ;;  %3302 = vmatprep.mubr.msk.f32.mxu1 %vm3831_vm0, %v3830_v1  ;;  %v51_v4 = vld [vmem:[%s4638_s1 + $0x10] sm:$0xff]  ;;  %vm62_vm1 = vcmask 392192   ;;  %v136_v12 = vlaneseq  ;;  %vm142_vm3 = vcmask 261120  }
   0x4   :  { %3282 = vmatpush3.msra.mxu0 %v53_v2  ;;  %v50_v5 = vld [vmem:[%s4638_s1 + $0x8] sm:$0xff]  ;;  %v49_v6 = vld [vmem:[%s4638_s1] sm:$0xff]  ;;  %v184_v8 = vld [vmem:[%s4643_s6 + $0x18] sm:$0xff] }
   0x5   :  { %3283 = vmatprep.subr.mxu0 %v3830_v1  ;;  %v48_v7 = vld [vmem:[%s4637_s0] sm:$0xff]  ;;  %3295 = vmatpush3.msra.mxu1 %v184_v8  ;;  %v183_v9 = vld [vmem:[%s4643_s6 + $0x10] sm:$0xff]  ;;  %v182_v10 = vld [vmem:[%s4643_s6 + $0x8] sm:$0xff]  ;;  %v137_v13 = vshrl.u32 %v136_v12, 7 }
   0x6   :  { %3284 = vmatpush3.msra.mxu0 %v52_v3  ;;  %3296 = vmatprep.subr.mxu1 %v3830_v1  ;;  %v181_v11 = vld [vmem:[%s4643_s6] sm:$0xff]  ;;  %v266_v47 = vld [vmem:[%s4642_s5 + $0x8] sm:$0xff]  ;;  %v3985_v48 = vld [vmem:[%s4644_s7 + $0x18] sm:$0xff] }
   0x7   :  { %3285 = vmatprep.subr.mxu0 %v3830_v1  ;;  %3297 = vmatpush3.msra.mxu1 %v183_v9  ;;  %vm138_vm2 = vcmp.lt.s32.totalorder %v137_v13, 4  ;;  %v3040_v14 = vld [vmem:[%s4639_s2] ss:$0 sm:$0xff]  ;;  %v267_v49 = vld [vmem:[%s4642_s5 + $0x10] sm:$0xff]  ;;  %v268_v51 = vld [vmem:[%s4642_s5 + $0x18] sm:$0xff] }
   0x8   :  { %3286 = vmatpush3.msra.mxu0 %v51_v4  ;;  %3298 = vmatprep.subr.mxu1 %v3830_v1  ;;  %v3042_v16 = vsel %vm138_vm2, 1.0, %v3830_v1  ;;  %v3043_v41 = vld [vmem:[%s4640_s3] ss:$0 sm:$0xff]  ;;  %v3995_v50 = vld [vmem:[%s4644_s7 + $0x10] sm:$0xff]  ;;  %v4009_v53 = vld [vmem:[%s4644_s7 + $0x8] sm:$0xff] }
   0x9   :  { %3287 = vmatprep.subr.mxu0 %v3830_v1  ;;  %3299 = vmatpush3.msra.mxu1 %v182_v10  ;;  %v3044_v43 = vld [vmem:[%s4641_s4] ss:$0 sm:$0xff]  ;;  %v270_v55 = vld [vmem:[%s4642_s5 + $0x28] sm:$0xff]  ;;  %v271_v56 = vld [vmem:[%s4642_s5 + $0x30] sm:$0xff] }
   0xa   :  { %3288 = vmatpush3.msra.mxu0 %v50_v5  ;;  %3300 = vmatprep.subr.mxu1 %v3830_v1  ;;  %v265_v46 = vld [vmem:[%s4642_s5] sm:$0xff]  ;;  %v272_v57 = vld [vmem:[%s4642_s5 + $0x38] sm:$0xff] }
   0xb   :  { %3289 = vmatprep.subr.mxu0 %v3830_v1  ;;  %3301 = vmatpush3.msra.mxu1 %v181_v11  ;;  %v269_v52 = vld [vmem:[%s4642_s5 + $0x20] sm:$0xff]  ;;  %s3832_s5 = smov 64  }
   0xc   :  { %3290 = vmatpush3.msra.mxu0 %v49_v6  ;;  %3305 = vmatprep.subr.mxu1 %v184_v8  ;;  %v4017_v54 = vld [vmem:[%s4644_s7] sm:$0xff] }
   0xd   :  { %3292 = vmatmul.mubr.msk.f32.vlgmr.msra.gmra.mxu0 %vm62_vm1, %v48_v7  ;;  %3336 = vmatprep.subr.mxu0 %v3830_v1  ;;  %v3045_v60 = vld [vmem:[%s4645_s8] ss:$0 sm:$0xff]  ;;  %s3833_s8 = smov 32  }
   0xe   :  { %3344 = vmatprep.mubr.msk.f32.mxu0 %vm3831_vm0, %v3830_v1 }
  0xcd   :  { %v132_v15 = vpop.f32.mrf.mxu0 }
  0xce   :  { %v133_v17 = vadd.f32 %v3040_v14, %v132_v15 }
  0xcf   :  { %v3293_v18 = vpop.f32.mrf.mxu0 }
  0xd0   :  { %v141_v19 = vmul.f32 %v3042_v16, %v133_v17 }
  0xd2   :  { %v143_v20 = vsel %vm142_vm3, %v141_v19, 0.0 }
  0xd3   :  { %v144_v21 = vrot.slane %v143_v20, 4 }
  0xd5   :  { %v145_v22 = vadd.f32 %v144_v21, %v143_v20 }
  0xd7   :  { %v146_v23 = vrot.slane %v145_v22, 2 }
  0xd9   :  { %v147_v24 = vadd.f32 %v146_v23, %v145_v22 }
  0xdb   :  { %v148_v25 = vrot.slane %v147_v24, 1 }
  0xdd   :  { %v149_v26 = vadd.f32 %v148_v25, %v147_v24 }
  0xdf   :  { %v150_v27 = vmul.f32 0.25, %v149_v26 }
  0xe1   :  { %v151_v28 = vsub.f32 %v133_v17, %v150_v27 }
  0xe3   :  { %v152_v29 = vmul.f32 %v151_v28, %v151_v28 }
  0xe5   :  { %v153_v30 = vmul.f32 %v3042_v16, %v152_v29  ;;  %v4073_v29 = vld [vmem:[%s4647_s10 + $0x10] sm:$0xff] }
  0xe7   :  { %v154_v31 = vsel %vm142_vm3, %v153_v30, 0.0  ;;  %v4079_v30 = vld [vmem:[%s4646_s9 + $0x18] sm:$0xff] }
  0xe8   :  { %v155_v32 = vrot.slane %v154_v31, 4 }
  0xea   :  { %v156_v33 = vadd.f32 %v155_v32, %v154_v31  ;;  %v4084_v31 = vld [vmem:[%s4646_s9 + $0x10] sm:$0xff]  ;;  %v4090_v32 = vld [vmem:[%s4647_s10 + $0x8] sm:$0xff] }
  0xec   :  { %v157_v34 = vrot.slane %v156_v33, 2 }
  0xee   :  { %v158_v35 = vadd.f32 %v157_v34, %v156_v33  ;;  %v4098_v33 = vld [vmem:[%s4646_s9 + $0x8] sm:$0xff]  ;;  %v4104_v34 = vld [vmem:[%s4647_s10] sm:$0xff] }
  0xf0   :  { %v159_v36 = vrot.slane %v158_v35, 1 }
  0xf2   :  { %v160_v37 = vadd.f32 %v159_v36, %v158_v35  ;;  %v4114_v35 = vld [vmem:[%s4646_s9] sm:$0xff] }
  0xf4   :  { %v161_v38 = vmul.f32 0.25, %v160_v37 }
  0xf6   :  { %v162_v39 = vadd.f32 1e-05, %v161_v38 }
  0xf8   :  { %3649 = vrsqrt.f32 %v162_v39 }
 0x105   :  { %v3650_v40 = vpop.eup %3649 }
 0x106   :  { %v164_v42 = vmul.f32 %v3650_v40, %v151_v28  ;;  %v4068_v28 = vld [vmem:[%s4647_s10 + $0x18] sm:$0xff] }
 0x107   :  { %3337 = vmatpush3.msra.mxu0 %v4068_v28 }
 0x108   :  { %v172_v44 = vmul.f32 %v3043_v41, %v164_v42  ;;  %3338 = vmatprep.subr.mxu0 %v3830_v1  ;;  %v4159_v42 = vld [vmem:[%s4648_s11] ss:$0 sm:$0xff] }
 0x109   :  { %3339 = vmatpush3.msra.mxu0 %v4073_v29 }
 0x10a   :  { %v180_v45 = vadd.f32 %v3044_v43, %v172_v44  ;;  %3340 = vmatprep.subr.mxu0 %v3830_v1 }
 0x10b   :  { %3341 = vmatpush3.msra.mxu0 %v4090_v32 }
 0x10c   :  { %3303 = vmatmul.mubr.msk.f32.vlgmr.msra.gmra.mxu1 %vm142_vm3, %v180_v45  ;;  %3342 = vmatprep.subr.mxu0 %v3830_v1 }
 0x10d   :  { %3306 = vmatpush3.msra.mxu1 %v184_v8  ;;  %3313 = vmatprep.mubr.msk.f32.mxu1 %vm142_vm3, %v265_v46 }
 0x10e   :  { %3307 = vmatprep.subr.mxu1 %v183_v9  ;;  %3343 = vmatpush3.msra.mxu0 %v4104_v34 }
 0x10f   :  { %3308 = vmatpush3.msra.mxu1 %v183_v9  ;;  %3358 = vmatprep.subr.mxu0 %v3830_v1 }
 0x110   :  { %3309 = vmatprep.subr.mxu1 %v182_v10  ;;  %3345 = vmatmul.mubr.f32.vlgmr.msra.gmra.mxu0 %v3830_v1 }
 0x111   :  { %3310 = vmatpush3.msra.mxu1 %v182_v10  ;;  %3359 = vmatpush3.msra.mxu0 %v3985_v48 }
 0x112   :  { %3311 = vmatprep.subr.mxu1 %v181_v11  ;;  %3360 = vmatprep.subr.mxu0 %v3830_v1 }
 0x113   :  { %3312 = vmatpush3.msra.mxu1 %v181_v11  ;;  %3366 = vmatprep.mubr.msk.f32.mxu0 %vm3831_vm0, %v3830_v1 }
 0x114   :  { %3314 = vmatmul.mubr.msk.f32.vlgmr.msra.gmra.mxu1 %vm142_vm3, %v266_v47  ;;  %3325 = vmatprep.subr.mxu1 %v3830_v1 }
 0x115   :  { %3326 = vmatpush3.msra.mxu1 %v3985_v48  ;;  %3316 = vmatprep.mubr.msk.f32.mxu1 %vm142_vm3, %v267_v49 }
 0x116   :  { %3327 = vmatprep.subr.mxu1 %v3830_v1  ;;  %3361 = vmatpush3.msra.mxu0 %v3995_v50 }
 0x117   :  { %3328 = vmatpush3.msra.mxu1 %v3995_v50  ;;  %3362 = vmatprep.subr.mxu0 %v3830_v1 }
 0x118   :  { %3317 = vmatmul.mubr.msk.f32.gmra.mxu1 %vm142_vm3, %v268_v51  ;;  %3329 = vmatprep.subr.mxu1 %v3830_v1 }
 0x119   :  { %3319 = vmatprep.mubr.msk.f32.mxu1 %vm142_vm3, %v269_v52  ;;  %3330 = vmatpush3.msra.mxu1 %v4009_v53 }
 0x11a   :  { %3331 = vmatprep.subr.mxu1 %v3830_v1  ;;  %3363 = vmatpush3.msra.mxu0 %v4009_v53 }
 0x11b   :  { %3332 = vmatpush3.msra.mxu1 %v4017_v54  ;;  %3364 = vmatprep.subr.mxu0 %v3830_v1 }
 0x11c   :  { %3320 = vmatmul.mubr.msk.f32.gmra.mxu1 %vm142_vm3, %v270_v55  ;;  %3347 = vmatprep.subr.mxu1 %v3830_v1 }
 0x11d   :  { %3322 = vmatprep.mubr.msk.f32.mxu1 %vm142_vm3, %v271_v56  ;;  %3365 = vmatpush3.msra.mxu0 %v4017_v54 }
 0x11e   :  { %3380 = vmatprep.subr.mxu0 %v3830_v1 }
 0x120   :  { %3323 = vmatmul.mubr.msk.f32.gmra.mxu1 %vm142_vm3, %v272_v57 }
 0x121   :  { %3333 = vmatprep.mubr.msk.f32.mxu1 %vm3831_vm0, %v3830_v1 }
 0x124   :  { %3334 = vmatmul.mubr.f32.vlgmr.msra.gmra.mxu1 %v3830_v1 }
 0x125   :  { %3355 = vmatprep.mubr.msk.f32.mxu1 %vm3831_vm0, %v3830_v1  ;;  %3348 = vmatpush3.msra.mxu1 %v4079_v30 }
 0x126   :  { %3349 = vmatprep.subr.mxu1 %v3830_v1 }
 0x127   :  { %3350 = vmatpush3.msra.mxu1 %v4084_v31 }
 0x128   :  { %3351 = vmatprep.subr.mxu1 %v3830_v1 }
 0x129   :  { %3352 = vmatpush3.msra.mxu1 %v4098_v33 }
 0x12a   :  { %3353 = vmatprep.subr.mxu1 %v3830_v1 }
 0x12b   :  { %3354 = vmatpush3.msra.mxu1 %v4114_v35 }
 0x12c   :  { %3369 = vmatprep.subr.mxu1 %v3830_v1 }
 0x1cc   :  { %v261_v58 = vpop.f32.mrf.mxu1 }
 0x1cd   :  { %v262_v13 = vadd.f32 %v3045_v60, %v261_v58 }
 0x1ce   :  { %v3304_v59 = vpop.f32.mrf.mxu1 }
 0x1d0   :  { %v585_v39 = vpop.f32.mrf.mxu0 }
 0x1d2   :  { %v3346_v40 = vpop.f32.mrf.mxu0 }
 0x1d4   :  { %v3315_v61 = vpop.f32.mrf.mxu1 }
 0x1d5   :  { %v4044_v62 = vadd.f32 %v3315_v61, %v3045_v60 }
 0x1d6   :  { %v363_v63 = vpop.f32.mrf.mxu1 }
 0x1d7   :  { %v4046_v0 = vadd.f32 %v3045_v60, %v363_v63 }
 0x1d8   :  { %v3318_v2 = vpop.f32.mrf.mxu1 }
 0x1d9   :  { %v4048_v3 = vadd.f32 %v3318_v2, %v3045_v60 }
 0x1da   :  { %v373_v4 = vpop.f32.mrf.mxu1 }
 0x1db   :  { %v4050_v5 = vadd.f32 %v3045_v60, %v373_v4 }
 0x1dc   :  { %v3321_v6 = vpop.f32.mrf.mxu1 }
 0x1dd   :  { %v4052_v7 = vadd.f32 %v3321_v6, %v3045_v60 }
 0x1de   :  { %v383_v8 = vpop.f32.mrf.mxu1 }
 0x1df   :  { %v4054_v9 = vadd.f32 %v3045_v60, %v383_v8 }
 0x1e0   :  { %v3324_v10 = vpop.f32.mrf.mxu1 }
 0x1e1   :  { %v4056_v11 = vadd.f32 %v3324_v10, %v3045_v60 }
 0x1e2   :  { %v393_v12 = vpop.f32.mrf.mxu1 }
 0x1e3   :  { %v4058_v14 = vadd.f32 %v3045_v60, %v393_v12 }
 0x1e4   :  { %v490_v15 = vpop.f32.mrf.mxu1 }
 0x1e5   :  { %v494_v16 = vadd.f32 %v490_v15, %v262_v13 }
 0x1e6   :  { %v3335_v17 = vpop.f32.mrf.mxu1 }
 0x1e7   :  { %3651 = vtanh.f32 %v494_v16  ;;  %v3056_v19 = vmul.f32 -1.442695, %v494_v16 }
 0x1e9   :  { %3653 = vpow2.f32 %v3056_v19 }
 0x1f4   :  { %v3652_v18 = vpop.eup %3651 }
 0x1f5   :  { %504 = vrot.lane.b32.xlu0 %v3652_v18, %s3832_s5 }
 0x1f6   :  { %v3654_v20 = vpop.eup %3653 }
 0x1f7   :  { %v498_v21 = vadd.f32 1.0, %v3654_v20 }
 0x1f9   :  { %3655 = vrcp.f32 %v498_v21 }
 0x206   :  { %v3656_v22 = vpop.eup %3655 }
 0x207   :  { %v502_v25 = vmul.f32 0.0, %v3656_v22 }
 0x267   :  { %v505_v23 = vpop.permute.xlu0 %504 }
 0x268   :  { %v507_v24 = vmul.f32 %v3656_v22, %v505_v23 }
 0x26a   :  { %509 = vrot.lane.b32.xlu0 %v507_v24, %s3833_s8 }
 0x2dc   :  { %v510_v26 = vpop.permute.xlu0 %509 }
 0x2dd   :  { %v4062_v27 = vadd.f32 %v510_v26, %v502_v25 }
 0x2df   :  { %3657 = vtanh.f32 %v4062_v27 }
 0x2ec   :  { %v3658_v36 = vpop.eup %3657 }
 0x2ed   :  { %515 = vrot.lane.b32.xlu1 %v3658_v36, %s3832_s5 }
 0x35f   :  { %v516_v37 = vpop.permute.xlu1 %515 }
 0x360   :  { %v518_v38 = vmul.f32 %v3656_v22, %v516_v37 }
 0x362   :  { %590 = vrot.lane.b32.xlu1 %v518_v38, %s3833_s8 }
 0x3d4   :  { %v591_v41 = vpop.permute.xlu1 %590 }
 0x3d5   :  { %3356 = vmatmul.mubr.msk.f32.vlgmr.msra.gmra.mxu1 %vm142_vm3, %v591_v41  ;;  %3367 = vmatmul.mubr.msk.f32.vlgmr.msra.gmra.mxu0 %vm142_vm3, %v591_v41 }
 0x3d6   :  { %3381 = vmatpush3.msra.mxu0 %v4079_v30  ;;  %3370 = vmatpush3.msra.mxu1 %v4068_v28 }
 0x3d7   :  { %3382 = vmatprep.subr.mxu0 %v3830_v1  ;;  %3371 = vmatprep.subr.mxu1 %v3830_v1 }
 0x3d8   :  { %3383 = vmatpush3.msra.mxu0 %v4084_v31  ;;  %3372 = vmatpush3.msra.mxu1 %v4073_v29 }
 0x3d9   :  { %3384 = vmatprep.subr.mxu0 %v3830_v1  ;;  %3373 = vmatprep.subr.mxu1 %v3830_v1 }
 0x3da   :  { %3385 = vmatpush3.msra.mxu0 %v4098_v33  ;;  %3374 = vmatpush3.msra.mxu1 %v4090_v32 }
 0x3db   :  { %3386 = vmatprep.subr.mxu0 %v3830_v1  ;;  %3375 = vmatprep.subr.mxu1 %v3830_v1 }
 0x3dc   :  { %3387 = vmatpush3.msra.mxu0 %v4114_v35  ;;  %3388 = vmatprep.mubr.msk.f32.mxu0 %vm3831_vm0, %v3830_v1 }
 0x3dd   :  { %3376 = vmatpush3.msra.mxu1 %v4104_v34  ;;  %3377 = vmatprep.mubr.msk.f32.mxu1 %vm3831_vm0, %v3830_v1 }
 0x3de   :  { %3391 = vmatprep.subr.mxu1 %v3830_v1  ;;  %3402 = vmatprep.subr.mxu0 %v3830_v1 }
 0x495   :  { %v660_v43 = vpop.f32.mrf.mxu1  ;;  %v755_v44 = vpop.f32.mrf.mxu0 }
 0x496   :  { %v661_v45 = vadd.f32 %v660_v43, %v585_v39  ;;  %v759_v46 = vadd.f32 %v755_v44, %v4046_v0 }
 0x497   :  { %v3357_v47 = vpop.f32.mrf.mxu1  ;;  %v3368_v49 = vpop.f32.mrf.mxu0 }
 0x498   :  { %v664_v51 = vadd.f32 %v4159_v42, %v661_v45  ;;  %3659 = vtanh.f32 %v759_v46  ;;  %v3060_v56 = vmul.f32 -1.442695, %v759_v46 }
 0x49a   :  { %3661 = vtanh.f32 %v664_v51  ;;  %v3058_v57 = vmul.f32 -1.442695, %v664_v51 }
 0x49b   :  { %3663 = vpow2.f32 %v3060_v56 }
 0x49c   :  { %3665 = vpow2.f32 %v3058_v57 }
 0x4a5   :  { %v3660_v52 = vpop.eup %3659 }
 0x4a6   :  { %769 = vrot.lane.b32.xlu1 %v3660_v52, %s3832_s5 }
 0x4a7   :  { %v3662_v55 = vpop.eup %3661 }
 0x4a8   :  { %674 = vrot.lane.b32.xlu0 %v3662_v55, %s3832_s5  ;;  %v3664_v58 = vpop.eup %3663 }
 0x4a9   :  { %v3666_v59 = vpop.eup %3665  ;;  %v763_v60 = vadd.f32 1.0, %v3664_v58 }
 0x4aa   :  { %v668_v61 = vadd.f32 1.0, %v3666_v59 }
 0x4ab   :  { %3667 = vrcp.f32 %v763_v60 }
 0x4ac   :  { %3669 = vrcp.f32 %v668_v61 }
 0x4b8   :  { %v3668_v63 = vpop.eup %3667 }
 0x4b9   :  { %v3670_v4 = vpop.eup %3669  ;;  %v767_v10 = vmul.f32 %v3668_v63, %v4062_v27 }
 0x4ba   :  { %v672_v15 = vmul.f32 0.0, %v3670_v4 }
 0x518   :  { %v770_v0 = vpop.permute.xlu1 %769 }
 0x519   :  { %v772_v2 = vmul.f32 %v3668_v63, %v770_v0 }
 0x51a   :  { %v675_v6 = vpop.permute.xlu0 %674 }
 0x51b   :  { %v677_v8 = vmul.f32 %v3670_v4, %v675_v6  ;;  %774 = vrot.lane.b32.xlu1 %v772_v2, %s3833_s8 }
 0x51d   :  { %679 = vrot.lane.b32.xlu0 %v677_v8, %s3833_s8 }
 0x58d   :  { %v775_v12 = vpop.permute.xlu1 %774 }
 0x58e   :  { %v4168_v13 = vadd.f32 %v775_v12, %v767_v10 }
 0x58f   :  { %v680_v16 = vpop.permute.xlu0 %679 }
 0x590   :  { %3671 = vtanh.f32 %v4168_v13  ;;  %v4171_v17 = vadd.f32 %v680_v16, %v672_v15 }
 0x592   :  { %3673 = vtanh.f32 %v4171_v17 }
 0x59d   :  { %v3672_v18 = vpop.eup %3671 }
 0x59e   :  { %780 = vrot.lane.b32.xlu1 %v3672_v18, %s3832_s5 }
 0x59f   :  { %v3674_v19 = vpop.eup %3673 }
 0x5a0   :  { %685 = vrot.lane.b32.xlu0 %v3674_v19, %s3832_s5 }
 0x610   :  { %v781_v20 = vpop.permute.xlu1 %780 }
 0x611   :  { %v783_v21 = vmul.f32 %v3668_v63, %v781_v20 }
 0x612   :  { %v686_v22 = vpop.permute.xlu0 %685 }
 0x613   :  { %v688_v23 = vmul.f32 %v3670_v4, %v686_v22  ;;  %860 = vrot.lane.b32.xlu1 %v783_v21, %s3833_s8 }
 0x615   :  { %785 = vrot.lane.b32.xlu0 %v688_v23, %s3833_s8 }
 0x685   :  { %v861_v24 = vpop.permute.xlu1 %860 }
 0x686   :  { %3389 = vmatmul.mubr.msk.f32.vlgmr.msra.gmra.mxu0 %vm142_vm3, %v861_v24 }
 0x687   :  { %v786_v25 = vpop.permute.xlu0 %785  ;;  %3403 = vmatpush3.msra.mxu0 %v4068_v28  ;;  %3410 = vmatprep.mubr.msk.f32.mxu0 %vm3831_vm0, %v3830_v1 }
 0x688   :  { %3378 = vmatmul.mubr.msk.f32.vlgmr.msra.gmra.mxu1 %vm142_vm3, %v786_v25  ;;  %3404 = vmatprep.subr.mxu0 %v3830_v1 }
 0x689   :  { %3392 = vmatpush3.msra.mxu1 %v3985_v48  ;;  %3399 = vmatprep.mubr.msk.f32.mxu1 %vm3831_vm0, %v3830_v1 }
 0x68a   :  { %3393 = vmatprep.subr.mxu1 %v3830_v1  ;;  %3405 = vmatpush3.msra.mxu0 %v4073_v29 }
 0x68b   :  { %3394 = vmatpush3.msra.mxu1 %v3995_v50  ;;  %3406 = vmatprep.subr.mxu0 %v3830_v1 }
 0x68c   :  { %3395 = vmatprep.subr.mxu1 %v3830_v1  ;;  %3407 = vmatpush3.msra.mxu0 %v4090_v32 }
 0x68d   :  { %3396 = vmatpush3.msra.mxu1 %v4009_v53  ;;  %3408 = vmatprep.subr.mxu0 %v3830_v1 }
 0x68e   :  { %3397 = vmatprep.subr.mxu1 %v3830_v1  ;;  %3409 = vmatpush3.msra.mxu0 %v4104_v34 }
 0x68f   :  { %3398 = vmatpush3.msra.mxu1 %v4017_v54  ;;  %3424 = vmatprep.subr.mxu0 %v3830_v1 }
 0x690   :  { %3400 = vmatmul.mubr.msk.f32.vlgmr.msra.gmra.mxu1 %vm142_vm3, %v861_v24  ;;  %3413 = vmatprep.subr.mxu1 %v3830_v1 }
 0x691   :  { %3414 = vmatpush3.msra.mxu1 %v4079_v30  ;;  %3421 = vmatprep.mubr.msk.f32.mxu1 %vm3831_vm0, %v3830_v1 }
 0x692   :  { %3415 = vmatprep.subr.mxu1 %v3830_v1 }
 0x693   :  { %3416 = vmatpush3.msra.mxu1 %v4084_v31 }
 0x694   :  { %3417 = vmatprep.subr.mxu1 %v3830_v1 }
 0x695   :  { %3418 = vmatpush3.msra.mxu1 %v4098_v33 }
 0x696   :  { %3419 = vmatprep.subr.mxu1 %v3830_v1 }
 0x697   :  { %3420 = vmatpush3.msra.mxu1 %v4114_v35 }
 0x698   :  { %3435 = vmatprep.subr.mxu1 %v3830_v1 }
 0x746   :  { %v930_v26 = vpop.f32.mrf.mxu0 }
 0x748   :  { %v855_v27 = vpop.f32.mrf.mxu1  ;;  %v3390_v36 = vpop.f32.mrf.mxu0 }
 0x749   :  { %v931_v37 = vadd.f32 %v930_v26, %v855_v27 }
 0x74a   :  { %v3379_v38 = vpop.f32.mrf.mxu1 }
 0x74b   :  { %v934_v39 = vadd.f32 %v4159_v42, %v931_v37 }
 0x74d   :  { %3675 = vtanh.f32 %v934_v39  ;;  %v3063_v46 = vmul.f32 -1.442695, %v934_v39 }
 0x750   :  { %v1030_v40 = vpop.f32.mrf.mxu1 }
 0x751   :  { %v1034_v41 = vadd.f32 %v1030_v40, %v4044_v62 }
 0x752   :  { %v3401_v43 = vpop.f32.mrf.mxu1 }
 0x753   :  { %3677 = vtanh.f32 %v1034_v41  ;;  %v3065_v47 = vmul.f32 -1.442695, %v1034_v41 }
 0x754   :  { %3679 = vpow2.f32 %v3063_v46 }
 0x755   :  { %3681 = vpow2.f32 %v3065_v47 }
 0x75a   :  { %v3676_v44 = vpop.eup %3675 }
 0x75b   :  { %944 = vrot.lane.b32.xlu0 %v3676_v44, %s3832_s5 }
 0x760   :  { %v3678_v45 = vpop.eup %3677 }
 0x761   :  { %1044 = vrot.lane.b32.xlu1 %v3678_v45, %s3832_s5  ;;  %v3680_v49 = vpop.eup %3679 }
 0x762   :  { %v938_v51 = vadd.f32 1.0, %v3680_v49  ;;  %v3682_v52 = vpop.eup %3681 }
 0x763   :  { %v1038_v55 = vadd.f32 1.0, %v3682_v52 }
 0x764   :  { %3683 = vrcp.f32 %v938_v51 }
 0x765   :  { %3685 = vrcp.f32 %v1038_v55 }
 0x771   :  { %v3684_v56 = vpop.eup %3683 }
 0x772   :  { %v3686_v58 = vpop.eup %3685  ;;  %v942_v61 = vmul.f32 %v3684_v56, %v4171_v17 }
 0x773   :  { %v1042_v2 = vmul.f32 %v3686_v58, %v4168_v13 }
 0x7cd   :  { %v945_v62 = vpop.permute.xlu0 %944 }
 0x7ce   :  { %v947_v57 = vmul.f32 %v3684_v56, %v945_v62 }
 0x7d0   :  { %949 = vrot.lane.b32.xlu0 %v947_v57, %s3833_s8 }
 0x7d3   :  { %v1045_v59 = vpop.permute.xlu1 %1044 }
 0x7d4   :  { %v1047_v60 = vmul.f32 %v3686_v58, %v1045_v59 }
 0x7d6   :  { %1049 = vrot.lane.b32.xlu1 %v1047_v60, %s3833_s8 }
 0x842   :  { %v950_v63 = vpop.permute.xlu0 %949 }
 0x843   :  { %v4218_v0 = vadd.f32 %v950_v63, %v942_v61 }
 0x845   :  { %3687 = vtanh.f32 %v4218_v0 }
 0x848   :  { %v1050_v4 = vpop.permute.xlu1 %1049 }
 0x849   :  { %v4222_v6 = vadd.f32 %v1050_v4, %v1042_v2 }
 0x84b   :  { %3689 = vtanh.f32 %v4222_v6 }
 0x852   :  { %v3688_v8 = vpop.eup %3687 }
 0x853   :  { %955 = vrot.lane.b32.xlu0 %v3688_v8, %s3832_s5 }
 0x858   :  { %v3690_v10 = vpop.eup %3689 }
 0x859   :  { %1055 = vrot.lane.b32.xlu1 %v3690_v10, %s3832_s5 }
 0x8c5   :  { %v956_v12 = vpop.permute.xlu0 %955 }
 0x8c6   :  { %v958_v15 = vmul.f32 %v3684_v56, %v956_v12 }
 0x8c8   :  { %960 = vrot.lane.b32.xlu0 %v958_v15, %s3833_s8 }
 0x8cb   :  { %v1056_v16 = vpop.permute.xlu1 %1055 }
 0x8cc   :  { %v1058_v17 = vmul.f32 %v3686_v58, %v1056_v16 }
 0x8ce   :  { %1132 = vrot.lane.b32.xlu1 %v1058_v17, %s3833_s8 }
 0x93a   :  { %v961_v13 = vpop.permute.xlu0 %960 }
 0x93b   :  { %963 = vst.msk [vmem:[#allocation2] sm:$0xff] %vm142_vm3, %v961_v13  ;;  %3411 = vmatmul.mubr.msk.f32.vlgmr.msra.gmra.mxu0 %vm142_vm3, %v961_v13 }
 0x93c   :  { %3425 = vmatpush3.msra.mxu0 %v3985_v48  ;;  %3432 = vmatprep.mubr.msk.f32.mxu0 %vm3831_vm0, %v3830_v1 }
 0x93d   :  { %3426 = vmatprep.subr.mxu0 %v3830_v1 }
 0x93e   :  { %3427 = vmatpush3.msra.mxu0 %v3995_v50 }
 0x93f   :  { %3428 = vmatprep.subr.mxu0 %v3830_v1 }
 0x940   :  { %v1133_v18 = vpop.permute.xlu1 %1132  ;;  %3429 = vmatpush3.msra.mxu0 %v4009_v53 }
 0x941   :  { %3422 = vmatmul.mubr.msk.f32.vlgmr.msra.gmra.mxu1 %vm142_vm3, %v1133_v18  ;;  %3430 = vmatprep.subr.mxu0 %v3830_v1 }
 0x942   :  { %3431 = vmatpush3.msra.mxu0 %v4017_v54  ;;  %3436 = vmatpush3.msra.mxu1 %v4068_v28 }
 0x943   :  { %3433 = vmatmul.mubr.msk.f32.vlgmr.msra.gmra.mxu0 %vm142_vm3, %v1133_v18  ;;  %3446 = vmatprep.subr.mxu0 %v3830_v1 }
 0x944   :  { %3437 = vmatprep.subr.mxu1 %v3830_v1  ;;  %3447 = vmatpush3.msra.mxu0 %v4079_v30 }
 0x945   :  { %3438 = vmatpush3.msra.mxu1 %v4073_v29  ;;  %3448 = vmatprep.subr.mxu0 %v3830_v1 }
 0x946   :  { %3439 = vmatprep.subr.mxu1 %v3830_v1  ;;  %3449 = vmatpush3.msra.mxu0 %v4084_v31 }
 0x947   :  { %3440 = vmatpush3.msra.mxu1 %v4090_v32  ;;  %3450 = vmatprep.subr.mxu0 %v3830_v1 }
 0x948   :  { %3441 = vmatprep.subr.mxu1 %v3830_v1  ;;  %3451 = vmatpush3.msra.mxu0 %v4098_v33 }
 0x949   :  { %3442 = vmatpush3.msra.mxu1 %v4104_v34  ;;  %3452 = vmatprep.subr.mxu0 %v3830_v1 }
 0x94a   :  { %3443 = vmatprep.mubr.msk.f32.mxu1 %vm3831_vm0, %v3830_v1  ;;  %3453 = vmatpush3.msra.mxu0 %v4114_v35 }
 0x94b   :  { %3454 = vmatprep.mubr.msk.f32.mxu0 %vm3831_vm0, %v3830_v1  ;;  %3457 = vmatprep.subr.mxu1 %v3830_v1 }
 0x94c   :  { %3468 = vmatprep.subr.mxu0 %v3830_v1 }
 0x9fb   :  { %v1127_v19 = vpop.f32.mrf.mxu0 }
 0x9fd   :  { %v3412_v20 = vpop.f32.mrf.mxu0 }
 0xa01   :  { %v1202_v21 = vpop.f32.mrf.mxu1 }
 0xa02   :  { %v1203_v22 = vadd.f32 %v1202_v21, %v1127_v19 }
 0xa03   :  { %v3423_v23 = vpop.f32.mrf.mxu1  ;;  %v1302_v24 = vpop.f32.mrf.mxu0 }
 0xa04   :  { %v1206_v25 = vadd.f32 %v4159_v42, %v1203_v22  ;;  %v1306_v26 = vadd.f32 %v1302_v24, %v4050_v5 }
 0xa05   :  { %v3434_v27 = vpop.f32.mrf.mxu0 }
 0xa06   :  { %3691 = vtanh.f32 %v1206_v25  ;;  %v3068_v38 = vmul.f32 -1.442695, %v1206_v25  ;;  %v3070_v39 = vmul.f32 -1.442695, %v1306_v26 }
 0xa07   :  { %3693 = vtanh.f32 %v1306_v26 }
 0xa08   :  { %3695 = vpow2.f32 %v3068_v38 }
 0xa09   :  { %3697 = vpow2.f32 %v3070_v39 }
 0xa13   :  { %v3692_v36 = vpop.eup %3691 }
 0xa14   :  { %v3694_v37 = vpop.eup %3693  ;;  %1216 = vrot.lane.b32.xlu0 %v3692_v36, %s3832_s5 }
 0xa15   :  { %1316 = vrot.lane.b32.xlu1 %v3694_v37, %s3832_s5  ;;  %v3696_v40 = vpop.eup %3695 }
 0xa16   :  { %v3698_v41 = vpop.eup %3697  ;;  %v1210_v43 = vadd.f32 1.0, %v3696_v40 }
 0xa17   :  { %v1310_v44 = vadd.f32 1.0, %v3698_v41 }
 0xa18   :  { %3699 = vrcp.f32 %v1210_v43 }
 0xa19   :  { %3701 = vrcp.f32 %v1310_v44 }
 0xa25   :  { %v3700_v5 = vpop.eup %3699 }
 0xa26   :  { %v3702_v46 = vpop.eup %3701  ;;  %v1214_v52 = vmul.f32 %v3700_v5, %v4218_v0 }
 0xa27   :  { %v1314_v56 = vmul.f32 %v3702_v46, %v4222_v6 }
 0xa86   :  { %v1217_v45 = vpop.permute.xlu0 %1216 }
 0xa87   :  { %v1219_v47 = vmul.f32 %v3700_v5, %v1217_v45  ;;  %v1317_v49 = vpop.permute.xlu1 %1316 }
 0xa88   :  { %v1319_v51 = vmul.f32 %v3702_v46, %v1317_v49 }
 0xa89   :  { %1221 = vrot.lane.b32.xlu0 %v1219_v47, %s3833_s8 }
 0xa8a   :  { %1321 = vrot.lane.b32.xlu1 %v1319_v51, %s3833_s8 }
 0xafb   :  { %v1222_v55 = vpop.permute.xlu0 %1221 }
 0xafc   :  { %v4271_v62 = vadd.f32 %v1222_v55, %v1214_v52  ;;  %v1322_v57 = vpop.permute.xlu1 %1321 }
 0xafd   :  { %v4273_v58 = vadd.f32 %v1322_v57, %v1314_v56 }
 0xafe   :  { %3703 = vtanh.f32 %v4271_v62 }
 0xaff   :  { %3705 = vtanh.f32 %v4273_v58 }
 0xb0b   :  { %v3704_v59 = vpop.eup %3703 }
 0xb0c   :  { %v3706_v60 = vpop.eup %3705  ;;  %1227 = vrot.lane.b32.xlu0 %v3704_v59, %s3832_s5 }
 0xb0d   :  { %1327 = vrot.lane.b32.xlu1 %v3706_v60, %s3832_s5 }
 0xb7e   :  { %v1228_v61 = vpop.permute.xlu0 %1227 }
 0xb7f   :  { %v1230_v63 = vmul.f32 %v3700_v5, %v1228_v61  ;;  %v1328_v0 = vpop.permute.xlu1 %1327 }
 0xb80   :  { %v1330_v2 = vmul.f32 %v3702_v46, %v1328_v0 }
 0xb81   :  { %1232 = vrot.lane.b32.xlu0 %v1230_v63, %s3833_s8 }
 0xb82   :  { %1404 = vrot.lane.b32.xlu1 %v1330_v2, %s3833_s8 }
 0xbf3   :  { %v1233_v4 = vpop.permute.xlu0 %1232 }
 0xbf4   :  { %1235 = vst.msk [vmem:[#allocation2 + $0x8] sm:$0xff] %vm142_vm3, %v1233_v4  ;;  %v1405_v6 = vpop.permute.xlu1 %1404  ;;  %3444 = vmatmul.mubr.msk.f32.vlgmr.msra.gmra.mxu1 %vm142_vm3, %v1233_v4 }
 0xbf5   :  { %3455 = vmatmul.mubr.msk.f32.vlgmr.msra.gmra.mxu0 %vm142_vm3, %v1405_v6  ;;  %3458 = vmatpush3.msra.mxu1 %v3985_v48 }
 0xbf6   :  { %3459 = vmatprep.subr.mxu1 %v3830_v1  ;;  %3465 = vmatprep.mubr.msk.f32.mxu1 %vm3831_vm0, %v3830_v1 }
 0xbf7   :  { %3460 = vmatpush3.msra.mxu1 %v3995_v50  ;;  %3469 = vmatpush3.msra.mxu0 %v4068_v28 }
 0xbf8   :  { %3461 = vmatprep.subr.mxu1 %v3830_v1  ;;  %3470 = vmatprep.subr.mxu0 %v3830_v1 }
 0xbf9   :  { %3462 = vmatpush3.msra.mxu1 %v4009_v53  ;;  %3471 = vmatpush3.msra.mxu0 %v4073_v29 }
 0xbfa   :  { %3463 = vmatprep.subr.mxu1 %v3830_v1  ;;  %3472 = vmatprep.subr.mxu0 %v3830_v1 }
 0xbfb   :  { %3464 = vmatpush3.msra.mxu1 %v4017_v54  ;;  %3473 = vmatpush3.msra.mxu0 %v4090_v32 }
 0xbfc   :  { %3466 = vmatmul.mubr.msk.f32.vlgmr.msra.gmra.mxu1 %vm142_vm3, %v1405_v6  ;;  %3474 = vmatprep.subr.mxu0 %v3830_v1 }
 0xbfd   :  { %3479 = vmatprep.subr.mxu1 %v3830_v1  ;;  %3475 = vmatpush3.msra.mxu0 %v4104_v34 }
 0xbfe   :  { %3480 = vmatpush3.msra.mxu1 %v4079_v30  ;;  %3476 = vmatprep.mubr.msk.f32.mxu0 %vm3831_vm0, %v3830_v1 }
 0xbff   :  { %3481 = vmatprep.subr.mxu1 %v3830_v1  ;;  %3490 = vmatprep.subr.mxu0 %v3830_v1 }
 0xc00   :  { %3482 = vmatpush3.msra.mxu1 %v4084_v31  ;;  %3487 = vmatprep.mubr.msk.f32.mxu1 %vm3831_vm0, %v3830_v1 }
 0xc01   :  { %3483 = vmatprep.subr.mxu1 %v3830_v1 }
 0xc02   :  { %3484 = vmatpush3.msra.mxu1 %v4098_v33 }
 0xc03   :  { %3485 = vmatprep.subr.mxu1 %v3830_v1 }
 0xc04   :  { %3486 = vmatpush3.msra.mxu1 %v4114_v35 }
 0xc05   :  { %3501 = vmatprep.subr.mxu1 %v3830_v1 }
 0xcb4   :  { %v1399_v8 = vpop.f32.mrf.mxu1 }
 0xcb5   :  { %v1474_v10 = vpop.f32.mrf.mxu0 }
 0xcb6   :  { %v1475_v12 = vadd.f32 %v1474_v10, %v1399_v8  ;;  %v3445_v15 = vpop.f32.mrf.mxu1 }
 0xcb7   :  { %v3456_v16 = vpop.f32.mrf.mxu0 }
 0xcb8   :  { %v1478_v17 = vadd.f32 %v4159_v42, %v1475_v12 }
 0xcba   :  { %3707 = vtanh.f32 %v1478_v17  ;;  %v3073_v22 = vmul.f32 -1.442695, %v1478_v17 }
 0xcbc   :  { %v1574_v13 = vpop.f32.mrf.mxu1 }
 0xcbd   :  { %v1578_v18 = vadd.f32 %v1574_v13, %v4048_v3 }
 0xcbe   :  { %v3467_v19 = vpop.f32.mrf.mxu1 }
 0xcbf   :  { %3709 = vtanh.f32 %v1578_v18  ;;  %v3075_v23 = vmul.f32 -1.442695, %v1578_v18 }
 0xcc0   :  { %3711 = vpow2.f32 %v3073_v22 }
 0xcc1   :  { %3713 = vpow2.f32 %v3075_v23 }
 0xcc7   :  { %v3708_v20 = vpop.eup %3707 }
 0xcc8   :  { %1488 = vrot.lane.b32.xlu0 %v3708_v20, %s3832_s5 }
 0xccc   :  { %v3710_v21 = vpop.eup %3709 }
 0xccd   :  { %1588 = vrot.lane.b32.xlu1 %v3710_v21, %s3832_s5  ;;  %v3712_v24 = vpop.eup %3711 }
 0xcce   :  { %v1482_v25 = vadd.f32 1.0, %v3712_v24  ;;  %v3714_v26 = vpop.eup %3713 }
 0xccf   :  { %v1582_v27 = vadd.f32 1.0, %v3714_v26 }
 0xcd0   :  { %3715 = vrcp.f32 %v1482_v25 }
 0xcd1   :  { %3717 = vrcp.f32 %v1582_v27 }
 0xcdd   :  { %v3716_v36 = vpop.eup %3715 }
 0xcde   :  { %v3718_v38 = vpop.eup %3717  ;;  %v1486_v41 = vmul.f32 %v3716_v36, %v4271_v62 }
 0xcdf   :  { %v1586_v5 = vmul.f32 %v3718_v38, %v4273_v58 }
 0xd3a   :  { %v1489_v3 = vpop.permute.xlu0 %1488 }
 0xd3b   :  { %v1491_v37 = vmul.f32 %v3716_v36, %v1489_v3 }
 0xd3d   :  { %1493 = vrot.lane.b32.xlu0 %v1491_v37, %s3833_s8 }
 0xd3f   :  { %v1589_v39 = vpop.permute.xlu1 %1588 }
 0xd40   :  { %v1591_v40 = vmul.f32 %v3718_v38, %v1589_v39 }
 0xd42   :  { %1593 = vrot.lane.b32.xlu1 %v1591_v40, %s3833_s8 }
 0xdaf   :  { %v1494_v43 = vpop.permute.xlu0 %1493 }
 0xdb0   :  { %v4322_v44 = vadd.f32 %v1494_v43, %v1486_v41  ;;  %v4391_v41 = vld [vmem:[%s4644_s7 + $0x18] sm:$0xff]  ;;  %v4400_v43 = vld [vmem:[%s4644_s7 + $0x10] sm:$0xff] }
 0xdb2   :  { %3719 = vtanh.f32 %v4322_v44 }
 0xdb4   :  { %v1594_v45 = vpop.permute.xlu1 %1593 }
 0xdb5   :  { %v4326_v46 = vadd.f32 %v1594_v45, %v1586_v5 }
 0xdb7   :  { %3721 = vtanh.f32 %v4326_v46 }
 0xdbf   :  { %v3720_v47 = vpop.eup %3719 }
 0xdc0   :  { %1499 = vrot.lane.b32.xlu0 %v3720_v47, %s3832_s5 }
 0xdc4   :  { %v3722_v49 = vpop.eup %3721 }
 0xdc5   :  { %1599 = vrot.lane.b32.xlu1 %v3722_v49, %s3832_s5 }
 0xe32   :  { %v1500_v51 = vpop.permute.xlu0 %1499 }
 0xe33   :  { %v1502_v52 = vmul.f32 %v3716_v36, %v1500_v51 }
 0xe35   :  { %1504 = vrot.lane.b32.xlu0 %v1502_v52, %s3833_s8 }
 0xe37   :  { %v1600_v55 = vpop.permute.xlu1 %1599 }
 0xe38   :  { %v1602_v56 = vmul.f32 %v3718_v38, %v1600_v55 }
 0xe3a   :  { %1676 = vrot.lane.b32.xlu1 %v1602_v56, %s3833_s8 }
 0xea7   :  { %v1505_v62 = vpop.permute.xlu0 %1504 }
 0xea8   :  { %1507 = vst.msk [vmem:[#allocation2 + $0x10] sm:$0xff] %vm142_vm3, %v1505_v62  ;;  %3477 = vmatmul.mubr.msk.f32.vlgmr.msra.gmra.mxu0 %vm142_vm3, %v1505_v62 }
 0xea9   :  { %3491 = vmatpush3.msra.mxu0 %v3985_v48  ;;  %3498 = vmatprep.mubr.msk.f32.mxu0 %vm3831_vm0, %v3830_v1 }
 0xeaa   :  { %3492 = vmatprep.subr.mxu0 %v3830_v1 }
 0xeab   :  { %3493 = vmatpush3.msra.mxu0 %v3995_v50 }
 0xeac   :  { %3494 = vmatprep.subr.mxu0 %v3830_v1  ;;  %v1677_v57 = vpop.permute.xlu1 %1676 }
 0xead   :  { %3495 = vmatpush3.msra.mxu0 %v4009_v53  ;;  %3488 = vmatmul.mubr.msk.f32.vlgmr.msra.gmra.mxu1 %vm142_vm3, %v1677_v57 }
 0xeae   :  { %3496 = vmatprep.subr.mxu0 %v3830_v1  ;;  %3502 = vmatpush3.msra.mxu1 %v4068_v28 }
 0xeaf   :  { %3497 = vmatpush3.msra.mxu0 %v4017_v54  ;;  %3503 = vmatprep.subr.mxu1 %v3830_v1 }
 0xeb0   :  { %3499 = vmatmul.mubr.msk.f32.vlgmr.msra.gmra.mxu0 %vm142_vm3, %v1677_v57  ;;  %3512 = vmatprep.subr.mxu0 %v3830_v1 }
 0xeb1   :  { %3513 = vmatpush3.msra.mxu0 %v4079_v30  ;;  %3504 = vmatpush3.msra.mxu1 %v4073_v29 }
 0xeb2   :  { %3514 = vmatprep.subr.mxu0 %v3830_v1  ;;  %3505 = vmatprep.subr.mxu1 %v3830_v1 }
 0xeb3   :  { %3515 = vmatpush3.msra.mxu0 %v4084_v31  ;;  %3506 = vmatpush3.msra.mxu1 %v4090_v32 }
 0xeb4   :  { %3516 = vmatprep.subr.mxu0 %v3830_v1  ;;  %3507 = vmatprep.subr.mxu1 %v3830_v1 }
 0xeb5   :  { %3517 = vmatpush3.msra.mxu0 %v4098_v33  ;;  %3508 = vmatpush3.msra.mxu1 %v4104_v34 }
 0xeb6   :  { %3518 = vmatprep.subr.mxu0 %v3830_v1  ;;  %3509 = vmatprep.mubr.msk.f32.mxu1 %vm3831_vm0, %v3830_v1 }
 0xeb7   :  { %3519 = vmatpush3.msra.mxu0 %v4114_v35  ;;  %3520 = vmatprep.mubr.msk.f32.mxu0 %vm3831_vm0, %v3830_v1 }
 0xeb8   :  { %3523 = vmatprep.subr.mxu1 %v3830_v1  ;;  %3534 = vmatprep.subr.mxu0 %v3830_v1 }
 0xf68   :  { %v1671_v48 = vpop.f32.mrf.mxu0 }
 0xf6a   :  { %v3478_v50 = vpop.f32.mrf.mxu0 }
 0xf6d   :  { %v1746_v53 = vpop.f32.mrf.mxu1 }
 0xf6e   :  { %v1747_v54 = vadd.f32 %v1746_v53, %v1671_v48 }
 0xf6f   :  { %v3489_v58 = vpop.f32.mrf.mxu1 }
 0xf70   :  { %v1750_v59 = vadd.f32 %v4159_v42, %v1747_v54  ;;  %v1846_v60 = vpop.f32.mrf.mxu0 }
 0xf71   :  { %v1850_v61 = vadd.f32 %v1846_v60, %v4054_v9 }
 0xf72   :  { %3723 = vtanh.f32 %v1750_v59  ;;  %v3500_v63 = vpop.f32.mrf.mxu0  ;;  %v3078_v4 = vmul.f32 -1.442695, %v1750_v59 }
 0xf73   :  { %3725 = vtanh.f32 %v1850_v61  ;;  %v3080_v6 = vmul.f32 -1.442695, %v1850_v61 }
 0xf74   :  { %3727 = vpow2.f32 %v3078_v4 }
 0xf75   :  { %3729 = vpow2.f32 %v3080_v6 }
 0xf7f   :  { %v3724_v0 = vpop.eup %3723 }
 0xf80   :  { %v3726_v2 = vpop.eup %3725  ;;  %1760 = vrot.lane.b32.xlu0 %v3724_v0, %s3832_s5 }
 0xf81   :  { %1860 = vrot.lane.b32.xlu1 %v3726_v2, %s3832_s5  ;;  %v3728_v8 = vpop.eup %3727 }
 0xf82   :  { %v3730_v10 = vpop.eup %3729  ;;  %v1754_v12 = vadd.f32 1.0, %v3728_v8 }
 0xf83   :  { %v1854_v15 = vadd.f32 1.0, %v3730_v10 }
 0xf84   :  { %3731 = vrcp.f32 %v1754_v12 }
 0xf85   :  { %3733 = vrcp.f32 %v1854_v15 }
 0xf91   :  { %v3732_v9 = vpop.eup %3731 }
 0xf92   :  { %v3734_v17 = vpop.eup %3733  ;;  %v1758_v20 = vmul.f32 %v3732_v9, %v4322_v44  ;;  %v4409_v44 = vld [vmem:[%s4644_s7 + $0x8] sm:$0xff] }
 0xf93   :  { %v1858_v22 = vmul.f32 %v3734_v17, %v4326_v46 }
 0xff2   :  { %v1761_v16 = vpop.permute.xlu0 %1760 }
 0xff3   :  { %v1763_v13 = vmul.f32 %v3732_v9, %v1761_v16  ;;  %v1861_v18 = vpop.permute.xlu1 %1860  ;;  %v4471_v16 = vld [vmem:[%s4647_s10 + $0x18] sm:$0xff] }
 0xff4   :  { %v1863_v19 = vmul.f32 %v3734_v17, %v1861_v18  ;;  %v4495_v18 = vld [vmem:[%s4646_s9 + $0x10] sm:$0xff] }
 0xff5   :  { %1765 = vrot.lane.b32.xlu0 %v1763_v13, %s3833_s8  ;;  %v4487_v13 = vld [vmem:[%s4647_s10 + $0x10] sm:$0xff] }
 0xff6   :  { %1865 = vrot.lane.b32.xlu1 %v1863_v19, %s3833_s8  ;;  %v4501_v19 = vld [vmem:[%s4647_s10 + $0x8] sm:$0xff] }
0x1067   :  { %v1766_v21 = vpop.permute.xlu0 %1765 }
0x1068   :  { %v4375_v23 = vadd.f32 %v1766_v21, %v1758_v20  ;;  %v1866_v24 = vpop.permute.xlu1 %1865  ;;  %v4509_v20 = vld [vmem:[%s4646_s9 + $0x8] sm:$0xff]  ;;  %v4515_v21 = vld [vmem:[%s4647_s10] sm:$0xff] }
0x1069   :  { %v4377_v25 = vadd.f32 %v1866_v24, %v1858_v22  ;;  %v4524_v22 = vld [vmem:[%s4646_s9] sm:$0xff] }
0x106a   :  { %3735 = vtanh.f32 %v4375_v23 }
0x106b   :  { %3737 = vtanh.f32 %v4377_v25 }
0x1077   :  { %v3736_v26 = vpop.eup %3735 }
0x1078   :  { %v3738_v27 = vpop.eup %3737  ;;  %1771 = vrot.lane.b32.xlu0 %v3736_v26, %s3832_s5 }
0x1079   :  { %1871 = vrot.lane.b32.xlu1 %v3738_v27, %s3832_s5 }
0x10ea   :  { %v1772_v36 = vpop.permute.xlu0 %1771 }
0x10eb   :  { %v1774_v3 = vmul.f32 %v3732_v9, %v1772_v36  ;;  %v1872_v37 = vpop.permute.xlu1 %1871 }
0x10ec   :  { %v1874_v38 = vmul.f32 %v3734_v17, %v1872_v37  ;;  %v4481_v17 = vld [vmem:[%s4646_s9 + $0x18] sm:$0xff] }
0x10ed   :  { %1776 = vrot.lane.b32.xlu0 %v1774_v3, %s3833_s8 }
0x10ee   :  { %1948 = vrot.lane.b32.xlu1 %v1874_v38, %s3833_s8 }
0x115f   :  { %v1777_v39 = vpop.permute.xlu0 %1776 }
0x1160   :  { %1779 = vst.msk [vmem:[#allocation2 + $0x18] sm:$0xff] %vm142_vm3, %v1777_v39  ;;  %v1949_v40 = vpop.permute.xlu1 %1948  ;;  %3510 = vmatmul.mubr.msk.f32.vlgmr.msra.gmra.mxu1 %vm142_vm3, %v1777_v39 }
0x1161   :  { %3521 = vmatmul.mubr.msk.f32.vlgmr.msra.gmra.mxu0 %vm142_vm3, %v1949_v40  ;;  %3524 = vmatpush3.msra.mxu1 %v4391_v41 }
0x1162   :  { %3525 = vmatprep.subr.mxu1 %v3830_v1  ;;  %3531 = vmatprep.mubr.msk.f32.mxu1 %vm3831_vm0, %v3830_v1 }
0x1163   :  { %3526 = vmatpush3.msra.mxu1 %v4400_v43  ;;  %3535 = vmatpush3.msra.mxu0 %v4068_v28  ;;  %v4418_v28 = vld [vmem:[%s4644_s7] sm:$0xff] }
0x1164   :  { %3527 = vmatprep.subr.mxu1 %v3830_v1  ;;  %3536 = vmatprep.subr.mxu0 %v3830_v1 }
0x1165   :  { %3528 = vmatpush3.msra.mxu1 %v4409_v44  ;;  %3537 = vmatpush3.msra.mxu0 %v4073_v29 }
0x1166   :  { %3529 = vmatprep.subr.mxu1 %v3830_v1  ;;  %3538 = vmatprep.subr.mxu0 %v3830_v1 }
0x1167   :  { %3530 = vmatpush3.msra.mxu1 %v4418_v28  ;;  %3539 = vmatpush3.msra.mxu0 %v4090_v32 }
0x1168   :  { %3532 = vmatmul.mubr.msk.f32.vlgmr.msra.gmra.mxu1 %vm142_vm3, %v1949_v40  ;;  %3540 = vmatprep.subr.mxu0 %v3830_v1 }
0x1169   :  { %3545 = vmatprep.subr.mxu1 %v3830_v1  ;;  %3541 = vmatpush3.msra.mxu0 %v4104_v34 }
0x116a   :  { %3546 = vmatpush3.msra.mxu1 %v4079_v30  ;;  %3542 = vmatprep.mubr.msk.f32.mxu0 %vm3831_vm0, %v3830_v1 }
0x116b   :  { %3547 = vmatprep.subr.mxu1 %v3830_v1  ;;  %3556 = vmatprep.subr.mxu0 %v3830_v1 }
0x116c   :  { %3548 = vmatpush3.msra.mxu1 %v4084_v31  ;;  %3553 = vmatprep.mubr.msk.f32.mxu1 %vm3831_vm0, %v3830_v1 }
0x116d   :  { %3549 = vmatprep.subr.mxu1 %v3830_v1 }
0x116e   :  { %3550 = vmatpush3.msra.mxu1 %v4098_v33 }
0x116f   :  { %3551 = vmatprep.subr.mxu1 %v3830_v1 }
0x1170   :  { %3552 = vmatpush3.msra.mxu1 %v4114_v35 }
0x1171   :  { %3567 = vmatprep.subr.mxu1 %v3830_v1 }
0x1220   :  { %v1943_v29 = vpop.f32.mrf.mxu1 }
0x1221   :  { %v2018_v30 = vpop.f32.mrf.mxu0 }
0x1222   :  { %v2019_v32 = vadd.f32 %v2018_v30, %v1943_v29  ;;  %v3511_v34 = vpop.f32.mrf.mxu1 }
0x1223   :  { %v3522_v5 = vpop.f32.mrf.mxu0 }
0x1224   :  { %v2022_v31 = vadd.f32 %v4159_v42, %v2019_v32 }
0x1226   :  { %3739 = vtanh.f32 %v2022_v31  ;;  %v3083_v35 = vmul.f32 -1.442695, %v2022_v31 }
0x1228   :  { %v2118_v45 = vpop.f32.mrf.mxu1 }
0x1229   :  { %v2122_v46 = vadd.f32 %v2118_v45, %v4052_v7 }
0x122a   :  { %v3533_v47 = vpop.f32.mrf.mxu1 }
0x122b   :  { %3741 = vtanh.f32 %v2122_v46  ;;  %v3085_v51 = vmul.f32 -1.442695, %v2122_v46 }
0x122c   :  { %3743 = vpow2.f32 %v3083_v35 }
0x122d   :  { %3745 = vpow2.f32 %v3085_v51 }
0x1233   :  { %v3740_v33 = vpop.eup %3739 }
0x1234   :  { %2032 = vrot.lane.b32.xlu0 %v3740_v33, %s3832_s5 }
0x1238   :  { %v3742_v49 = vpop.eup %3741 }
0x1239   :  { %2132 = vrot.lane.b32.xlu1 %v3742_v49, %s3832_s5  ;;  %v3744_v52 = vpop.eup %3743 }
0x123a   :  { %v2026_v55 = vadd.f32 1.0, %v3744_v52  ;;  %v3746_v56 = vpop.eup %3745 }
0x123b   :  { %v2126_v62 = vadd.f32 1.0, %v3746_v56 }
0x123c   :  { %3747 = vrcp.f32 %v2026_v55 }
0x123d   :  { %3749 = vrcp.f32 %v2126_v62 }
0x1249   :  { %v3748_v57 = vpop.eup %3747 }
0x124a   :  { %v3750_v50 = vpop.eup %3749  ;;  %v2030_v58 = vmul.f32 %v3748_v57, %v4375_v23 }
0x124b   :  { %v2130_v61 = vmul.f32 %v3750_v50, %v4377_v25 }
0x12a6   :  { %v2033_v7 = vpop.permute.xlu0 %2032 }
0x12a7   :  { %v2035_v48 = vmul.f32 %v3748_v57, %v2033_v7 }
0x12a9   :  { %2037 = vrot.lane.b32.xlu0 %v2035_v48, %s3833_s8 }
0x12ab   :  { %v2133_v53 = vpop.permute.xlu1 %2132 }
0x12ac   :  { %v2135_v54 = vmul.f32 %v3750_v50, %v2133_v53 }
0x12ae   :  { %2137 = vrot.lane.b32.xlu1 %v2135_v54, %s3833_s8 }
0x131b   :  { %v2038_v59 = vpop.permute.xlu0 %2037 }
0x131c   :  { %v4446_v60 = vadd.f32 %v2038_v59, %v2030_v58 }
0x131e   :  { %3751 = vtanh.f32 %v4446_v60 }
0x1320   :  { %v2138_v63 = vpop.permute.xlu1 %2137 }
0x1321   :  { %v4450_v0 = vadd.f32 %v2138_v63, %v2130_v61 }
0x1323   :  { %3753 = vtanh.f32 %v4450_v0 }
0x132b   :  { %v3752_v2 = vpop.eup %3751 }
0x132c   :  { %2043 = vrot.lane.b32.xlu0 %v3752_v2, %s3832_s5 }
0x1330   :  { %v3754_v4 = vpop.eup %3753 }
0x1331   :  { %2143 = vrot.lane.b32.xlu1 %v3754_v4, %s3832_s5 }
0x139e   :  { %v2044_v6 = vpop.permute.xlu0 %2043 }
0x139f   :  { %v2046_v8 = vmul.f32 %v3748_v57, %v2044_v6 }
0x13a1   :  { %2048 = vrot.lane.b32.xlu0 %v2046_v8, %s3833_s8 }
0x13a3   :  { %v2144_v10 = vpop.permute.xlu1 %2143 }
0x13a4   :  { %v2146_v12 = vmul.f32 %v3750_v50, %v2144_v10 }
0x13a6   :  { %2220 = vrot.lane.b32.xlu1 %v2146_v12, %s3833_s8 }
0x1413   :  { %v2049_v15 = vpop.permute.xlu0 %2048 }
0x1414   :  { %2051 = vst.msk [vmem:[#allocation2 + $0x20] sm:$0xff] %vm142_vm3, %v2049_v15  ;;  %3543 = vmatmul.mubr.msk.f32.vlgmr.msra.gmra.mxu0 %vm142_vm3, %v2049_v15 }
0x1415   :  { %3557 = vmatpush3.msra.mxu0 %v4391_v41  ;;  %3564 = vmatprep.mubr.msk.f32.mxu0 %vm3831_vm0, %v3830_v1 }
0x1416   :  { %3558 = vmatprep.subr.mxu0 %v3830_v1 }
0x1417   :  { %3559 = vmatpush3.msra.mxu0 %v4400_v43 }
0x1418   :  { %3560 = vmatprep.subr.mxu0 %v3830_v1  ;;  %v2221_v9 = vpop.permute.xlu1 %2220 }
0x1419   :  { %3561 = vmatpush3.msra.mxu0 %v4409_v44  ;;  %3554 = vmatmul.mubr.msk.f32.vlgmr.msra.gmra.mxu1 %vm142_vm3, %v2221_v9 }
0x141a   :  { %3562 = vmatprep.subr.mxu0 %v3830_v1  ;;  %3568 = vmatpush3.msra.mxu1 %v4471_v16 }
0x141b   :  { %3563 = vmatpush3.msra.mxu0 %v4418_v28  ;;  %3569 = vmatprep.subr.mxu1 %v3830_v1 }
0x141c   :  { %3565 = vmatmul.mubr.msk.f32.vlgmr.msra.gmra.mxu0 %vm142_vm3, %v2221_v9  ;;  %3578 = vmatprep.subr.mxu0 %v3830_v1 }
0x141d   :  { %3579 = vmatpush3.msra.mxu0 %v4481_v17  ;;  %3570 = vmatpush3.msra.mxu1 %v4487_v13 }
0x141e   :  { %3580 = vmatprep.subr.mxu0 %v3830_v1  ;;  %3571 = vmatprep.subr.mxu1 %v3830_v1 }
0x141f   :  { %3581 = vmatpush3.msra.mxu0 %v4495_v18  ;;  %3572 = vmatpush3.msra.mxu1 %v4501_v19 }
0x1420   :  { %3582 = vmatprep.subr.mxu0 %v3830_v1  ;;  %3573 = vmatprep.subr.mxu1 %v3830_v1 }
0x1421   :  { %3583 = vmatpush3.msra.mxu0 %v4509_v20  ;;  %3574 = vmatpush3.msra.mxu1 %v4515_v21 }
0x1422   :  { %3584 = vmatprep.subr.mxu0 %v3830_v1  ;;  %3575 = vmatprep.mubr.msk.f32.mxu1 %vm3831_vm0, %v3830_v1 }
0x1423   :  { %3585 = vmatpush3.msra.mxu0 %v4524_v22  ;;  %3586 = vmatprep.mubr.msk.f32.mxu0 %vm3831_vm0, %v3830_v1 }
0x1424   :  { %3589 = vmatprep.subr.mxu1 %v3830_v1  ;;  %3600 = vmatprep.subr.mxu0 %v3830_v1 }
0x14d4   :  { %v2215_v23 = vpop.f32.mrf.mxu0 }
0x14d6   :  { %v3544_v24 = vpop.f32.mrf.mxu0 }
0x14d9   :  { %v2290_v25 = vpop.f32.mrf.mxu1 }
0x14da   :  { %v2291_v26 = vadd.f32 %v2290_v25, %v2215_v23 }
0x14db   :  { %v3555_v27 = vpop.f32.mrf.mxu1 }
0x14dc   :  { %v2294_v36 = vadd.f32 %v4159_v42, %v2291_v26  ;;  %v2390_v3 = vpop.f32.mrf.mxu0  ;;  %v2879_v26 = vld [vmem:[%s4649_s12 + $0x18] sm:$0xff] }
0x14dd   :  { %v2394_v37 = vadd.f32 %v2390_v3, %v4058_v14 }
0x14de   :  { %3755 = vtanh.f32 %v2294_v36  ;;  %v3566_v38 = vpop.f32.mrf.mxu0  ;;  %v3088_v29 = vmul.f32 -1.442695, %v2294_v36 }
0x14df   :  { %3757 = vtanh.f32 %v2394_v37  ;;  %v3090_v30 = vmul.f32 -1.442695, %v2394_v37 }
0x14e0   :  { %3759 = vpow2.f32 %v3088_v29  ;;  %v2878_v29 = vld [vmem:[%s4649_s12 + $0x10] sm:$0xff] }
0x14e1   :  { %3761 = vpow2.f32 %v3090_v30  ;;  %v2868_v30 = vld [vmem:[#allocation2] sm:$0xff] }
0x14eb   :  { %v3756_v39 = vpop.eup %3755 }
0x14ec   :  { %v3758_v40 = vpop.eup %3757  ;;  %2304 = vrot.lane.b32.xlu0 %v3756_v39, %s3832_s5 }
0x14ed   :  { %2404 = vrot.lane.b32.xlu1 %v3758_v40, %s3832_s5  ;;  %v3760_v32 = vpop.eup %3759 }
0x14ee   :  { %v3762_v34 = vpop.eup %3761  ;;  %v2298_v5 = vadd.f32 1.0, %v3760_v32  ;;  %v2877_v32 = vld [vmem:[%s4649_s12 + $0x8] sm:$0xff] }
0x14ef   :  { %v2398_v42 = vadd.f32 1.0, %v3762_v34  ;;  %v2876_v34 = vld [vmem:[%s4649_s12] sm:$0xff] }
0x14f0   :  { %3763 = vrcp.f32 %v2298_v5 }
0x14f1   :  { %3765 = vrcp.f32 %v2398_v42  ;;  %v2869_v42 = vld [vmem:[#allocation2 + $0x8] sm:$0xff] }
0x14fd   :  { %v3764_v14 = vpop.eup %3763 }
0x14fe   :  { %v3766_v45 = vpop.eup %3765  ;;  %v2302_v49 = vmul.f32 %v3764_v14, %v4446_v60  ;;  %v4584_v60 = vld [vmem:[%s4648_s11] ss:$0 sm:$0xff] }
0x14ff   :  { %v2402_v51 = vmul.f32 %v3766_v45, %v4450_v0 }
0x155e   :  { %v2305_v31 = vpop.permute.xlu0 %2304 }
0x155f   :  { %v2307_v46 = vmul.f32 %v3764_v14, %v2305_v31  ;;  %v2405_v47 = vpop.permute.xlu1 %2404  ;;  %v2871_v31 = vld [vmem:[#allocation2 + $0x18] sm:$0xff] }
0x1560   :  { %v2407_v33 = vmul.f32 %v3766_v45, %v2405_v47 }
0x1561   :  { %2309 = vrot.lane.b32.xlu0 %v2307_v46, %s3833_s8 }
0x1562   :  { %2409 = vrot.lane.b32.xlu1 %v2407_v33, %s3833_s8 }
0x15d3   :  { %v2310_v35 = vpop.permute.xlu0 %2309 }
0x15d4   :  { %v4539_v52 = vadd.f32 %v2310_v35, %v2302_v49  ;;  %v2410_v55 = vpop.permute.xlu1 %2409 }
0x15d5   :  { %v4541_v56 = vadd.f32 %v2410_v55, %v2402_v51 }
0x15d6   :  { %3767 = vtanh.f32 %v4539_v52 }
0x15d7   :  { %3769 = vtanh.f32 %v4541_v56 }
0x15e3   :  { %v3768_v62 = vpop.eup %3767 }
0x15e4   :  { %v3770_v57 = vpop.eup %3769  ;;  %2315 = vrot.lane.b32.xlu0 %v3768_v62, %s3832_s5 }
0x15e5   :  { %2415 = vrot.lane.b32.xlu1 %v3770_v57, %s3832_s5 }
0x1656   :  { %v2316_v7 = vpop.permute.xlu0 %2315 }
0x1657   :  { %v2318_v48 = vmul.f32 %v3764_v14, %v2316_v7  ;;  %v2416_v50 = vpop.permute.xlu1 %2415  ;;  %v2870_v14 = vld [vmem:[#allocation2 + $0x10] sm:$0xff] }
0x1658   :  { %v2418_v53 = vmul.f32 %v3766_v45, %v2416_v50  ;;  %v2872_v45 = vld [vmem:[#allocation2 + $0x20] sm:$0xff] }
0x1659   :  { %2320 = vrot.lane.b32.xlu0 %v2318_v48, %s3833_s8 }
0x165a   :  { %2492 = vrot.lane.b32.xlu1 %v2418_v53, %s3833_s8 }
0x16cb   :  { %v2321_v54 = vpop.permute.xlu0 %2320 }
0x16cc   :  { %2323 = vst.msk [vmem:[#allocation2 + $0x28] sm:$0xff] %vm142_vm3, %v2321_v54  ;;  %v2493_v58 = vpop.permute.xlu1 %2492  ;;  %3576 = vmatmul.mubr.msk.f32.vlgmr.msra.gmra.mxu1 %vm142_vm3, %v2321_v54 }
0x16cd   :  { %3587 = vmatmul.mubr.msk.f32.vlgmr.msra.gmra.mxu0 %vm142_vm3, %v2493_v58  ;;  %3590 = vmatpush3.msra.mxu1 %v4391_v41 }
0x16ce   :  { %3591 = vmatprep.subr.mxu1 %v3830_v1  ;;  %3597 = vmatprep.mubr.msk.f32.mxu1 %vm3831_vm0, %v3830_v1 }
0x16cf   :  { %3592 = vmatpush3.msra.mxu1 %v4400_v43  ;;  %3601 = vmatpush3.msra.mxu0 %v4471_v16 }
0x16d0   :  { %3593 = vmatprep.subr.mxu1 %v3830_v1  ;;  %3602 = vmatprep.subr.mxu0 %v3830_v1 }
0x16d1   :  { %3594 = vmatpush3.msra.mxu1 %v4409_v44  ;;  %3603 = vmatpush3.msra.mxu0 %v4487_v13 }
0x16d2   :  { %3595 = vmatprep.subr.mxu1 %v3830_v1  ;;  %3604 = vmatprep.subr.mxu0 %v3830_v1 }
0x16d3   :  { %3596 = vmatpush3.msra.mxu1 %v4418_v28  ;;  %3605 = vmatpush3.msra.mxu0 %v4501_v19  ;;  %v2873_v46 = vld [vmem:[#allocation2 + $0x28] sm:$0xff] }
0x16d4   :  { %3598 = vmatmul.mubr.msk.f32.vlgmr.msra.gmra.mxu1 %vm142_vm3, %v2493_v58  ;;  %3606 = vmatprep.subr.mxu0 %v3830_v1 }
0x16d5   :  { %3611 = vmatprep.subr.mxu1 %v3830_v1  ;;  %3607 = vmatpush3.msra.mxu0 %v4515_v21 }
0x16d6   :  { %3612 = vmatpush3.msra.mxu1 %v4481_v17  ;;  %3608 = vmatprep.mubr.msk.f32.mxu0 %vm3831_vm0, %v3830_v1 }
0x16d7   :  { %3613 = vmatprep.subr.mxu1 %v3830_v1  ;;  %3619 = vmatprep.mubr.msk.f32.mxu1 %vm3831_vm0, %v3830_v1 }
0x16d8   :  { %3614 = vmatpush3.msra.mxu1 %v4495_v18  ;;  %3622 = vmatprep.subr.mxu0 %v2879_v26 }
0x16d9   :  { %3615 = vmatprep.subr.mxu1 %v3830_v1 }
0x16da   :  { %3616 = vmatpush3.msra.mxu1 %v4509_v20 }
0x16db   :  { %3617 = vmatprep.subr.mxu1 %v3830_v1 }
0x16dc   :  { %3618 = vmatpush3.msra.mxu1 %v4524_v22 }
0x178c   :  { %v2487_v41 = vpop.f32.mrf.mxu1 }
0x178d   :  { %v2562_v43 = vpop.f32.mrf.mxu0 }
0x178e   :  { %v2563_v44 = vadd.f32 %v2562_v43, %v2487_v41  ;;  %v3577_v28 = vpop.f32.mrf.mxu1 }
0x178f   :  { %v3588_v59 = vpop.f32.mrf.mxu0 }
0x1790   :  { %v2566_v61 = vadd.f32 %v4584_v60, %v2563_v44 }
0x1792   :  { %3771 = vtanh.f32 %v2566_v61  ;;  %v3093_v6 = vmul.f32 -1.442695, %v2566_v61 }
0x1794   :  { %v2662_v63 = vpop.f32.mrf.mxu1 }
0x1795   :  { %v2666_v0 = vadd.f32 %v2662_v63, %v4056_v11 }
0x1796   :  { %v3599_v2 = vpop.f32.mrf.mxu1 }
0x1797   :  { %3773 = vtanh.f32 %v2666_v0  ;;  %v3095_v8 = vmul.f32 -1.442695, %v2666_v0 }
0x1798   :  { %3775 = vpow2.f32 %v3093_v6 }
0x1799   :  { %3777 = vpow2.f32 %v3095_v8 }
0x179f   :  { %v3772_v1 = vpop.eup %3771 }
0x17a0   :  { %2576 = vrot.lane.b32.xlu0 %v3772_v1, %s3832_s5 }
0x17a4   :  { %v3774_v4 = vpop.eup %3773 }
0x17a5   :  { %2676 = vrot.lane.b32.xlu1 %v3774_v4, %s3832_s5  ;;  %v3776_v10 = vpop.eup %3775 }
0x17a6   :  { %v2570_v12 = vadd.f32 1.0, %v3776_v10  ;;  %v3778_v15 = vpop.eup %3777 }
0x17a7   :  { %v2670_v9 = vadd.f32 1.0, %v3778_v15 }
0x17a8   :  { %3779 = vrcp.f32 %v2570_v12 }
0x17a9   :  { %3781 = vrcp.f32 %v2670_v9 }
0x17b5   :  { %v3780_v16 = vpop.eup %3779 }
0x17b6   :  { %v3782_v13 = vpop.eup %3781  ;;  %v2574_v20 = vmul.f32 %v3780_v16, %v4539_v52  ;;  %v3099_v52 = vld [vmem:[%s4650_s13] ss:$0 sm:$0xff]  ;;  %s3834_s13 = smov [#allocation3]  }
0x17b7   :  { %v2674_v23 = vmul.f32 %v3782_v13, %v4541_v56  ;;  %s3029_s27 = sshll.u32 %s3834_s13, 4  ;;  %s3030_s27 = int_to_ptr.vmem [resolvable:$true] %s3029_s27 }
0x17b8   :  { %p3813_p1 = scmp.lt.s32.totalorder %s3030_s27, %s3030_s27 }
0x1812   :  { %v2577_v11 = vpop.permute.xlu0 %2576 }
0x1813   :  { %v2579_v17 = vmul.f32 %v3780_v16, %v2577_v11 }
0x1815   :  { %2581 = vrot.lane.b32.xlu0 %v2579_v17, %s3833_s8 }
0x1817   :  { %v2677_v18 = vpop.permute.xlu1 %2676 }
0x1818   :  { %v2679_v19 = vmul.f32 %v3782_v13, %v2677_v18 }
0x181a   :  { %2681 = vrot.lane.b32.xlu1 %v2679_v19, %s3833_s8 }
0x1887   :  { %v2582_v21 = vpop.permute.xlu0 %2581 }
0x1888   :  { %v4593_v22 = vadd.f32 %v2582_v21, %v2574_v20 }
0x188a   :  { %3783 = vtanh.f32 %v4593_v22 }
0x188c   :  { %v2682_v24 = vpop.permute.xlu1 %2681 }
0x188d   :  { %v2684_v25 = vadd.f32 %v2682_v24, %v2674_v23 }
0x188f   :  { %3785 = vtanh.f32 %v2684_v25 }
0x1897   :  { %v3784_v27 = vpop.eup %3783 }
0x1898   :  { %2587 = vrot.lane.b32.xlu0 %v3784_v27, %s3832_s5 }
0x189c   :  { %v3786_v36 = vpop.eup %3785 }
0x189d   :  { %2687 = vrot.lane.b32.xlu1 %v3786_v36, %s3832_s5 }
0x190a   :  { %v2588_v3 = vpop.permute.xlu0 %2587 }
0x190b   :  { %v2590_v37 = vmul.f32 %v3780_v16, %v2588_v3 }
0x190d   :  { %2592 = vrot.lane.b32.xlu0 %v2590_v37, %s3833_s8 }
0x190f   :  { %v2688_v38 = vpop.permute.xlu1 %2687 }
0x1910   :  { %v2690_v39 = vmul.f32 %v3782_v13, %v2688_v38 }
0x1912   :  { %2764 = vrot.lane.b32.xlu1 %v2690_v39, %s3833_s8 }
0x197f   :  { %v2593_v40 = vpop.permute.xlu0 %2592 }
0x1980   :  { %2595 = vst.msk [vmem:[#allocation2 + $0x30] sm:$0xff] %vm142_vm3, %v2593_v40  ;;  %3609 = vmatmul.mubr.msk.f32.vlgmr.msra.gmra.mxu0 %vm142_vm3, %v2593_v40 }
0x1981   :  { %3623 = vmatpush3.msra.mxu0 %v2879_v26  ;;  %3630 = vmatprep.mubr.msk.f32.mxu0 %vm142_vm3, %v2868_v30 }
0x1982   :  { %3624 = vmatprep.subr.mxu0 %v2878_v29 }
0x1983   :  { %3625 = vmatpush3.msra.mxu0 %v2878_v29 }
0x1984   :  { %3626 = vmatprep.subr.mxu0 %v2877_v32  ;;  %v2765_v5 = vpop.permute.xlu1 %2764 }
0x1985   :  { %3627 = vmatpush3.msra.mxu0 %v2877_v32  ;;  %3620 = vmatmul.mubr.msk.f32.vlgmr.msra.gmra.mxu1 %vm142_vm3, %v2765_v5 }
0x1986   :  { %3628 = vmatprep.subr.mxu0 %v2876_v34 }
0x1987   :  { %3629 = vmatpush3.msra.mxu0 %v2876_v34  ;;  %v2874_v47 = vld [vmem:[#allocation2 + $0x30] sm:$0xff] }
0x1988   :  { %3631 = vmatmul.mubr.msk.f32.vlgmr.msra.gmra.mxu0 %vm142_vm3, %v2869_v42 }
0x1989   :  { %3633 = vmatprep.mubr.msk.f32.mxu0 %vm142_vm3, %v2870_v14 }
0x198c   :  { %3634 = vmatmul.mubr.msk.f32.gmra.mxu0 %vm142_vm3, %v2871_v31 }
0x198d   :  { %3636 = vmatprep.mubr.msk.f32.mxu0 %vm142_vm3, %v2872_v45 }
0x1990   :  { %3637 = vmatmul.mubr.msk.f32.gmra.mxu0 %vm142_vm3, %v2873_v46 }
0x1991   :  { %3639 = vmatprep.mubr.msk.f32.mxu0 %vm142_vm3, %v2874_v47 }
0x1a40   :  { %v2759_v33 = vpop.f32.mrf.mxu0 }
0x1a42   :  { %v3610_v49 = vpop.f32.mrf.mxu0 }
0x1a45   :  { %v2834_v35 = vpop.f32.mrf.mxu1 }
0x1a46   :  { %v2835_v51 = vadd.f32 %v2834_v35, %v2759_v33 }
0x1a47   :  { %v3621_v55 = vpop.f32.mrf.mxu1 }
0x1a48   :  { %v2838_v56 = vadd.f32 %v4584_v60, %v2835_v51  ;;  %v3632_v62 = vpop.f32.mrf.mxu0 }
0x1a49   :  { %v2983_v57 = vadd.f32 %v3632_v62, %v3099_v52 }
0x1a4a   :  { %3787 = vtanh.f32 %v2838_v56  ;;  %v2977_v7 = vpop.f32.mrf.mxu0  ;;  %v3098_v60 = vmul.f32 -1.442695, %v2838_v56 }
0x1a4b   :  { %3017 = vst [vmem:[#allocation3 + $0x8] sm:$0xff] %v2983_v57  ;;  %v2978_v48 = vadd.f32 %v3099_v52, %v2977_v7 }
0x1a4c   :  { %v3635_v50 = vpop.f32.mrf.mxu0  ;;  %3789 = vpow2.f32 %v3098_v60 }
0x1a4d   :  { %3016 = vst [vmem:[#allocation3] sm:$0xff] %v2978_v48  ;;  %v2993_v53 = vadd.f32 %v3635_v50, %v3099_v52 }
0x1a4e   :  { %v2987_v54 = vpop.f32.mrf.mxu0 }
0x1a4f   :  { %3019 = vst [vmem:[#allocation3 + $0x18] sm:$0xff] %v2993_v53  ;;  %v2988_v58 = vadd.f32 %v3099_v52, %v2987_v54 }
0x1a50   :  { %v3638_v41 = vpop.f32.mrf.mxu0 }
0x1a51   :  { %3018 = vst [vmem:[#allocation3 + $0x10] sm:$0xff] %v2988_v58  ;;  %v3003_v43 = vadd.f32 %v3638_v41, %v3099_v52 }
0x1a52   :  { %v2997_v44 = vpop.f32.mrf.mxu0 }
0x1a53   :  { %3021 = vst [vmem:[#allocation3 + $0x28] sm:$0xff] %v3003_v43  ;;  %v2998_v28 = vadd.f32 %v3099_v52, %v2997_v44 }
0x1a55   :  { %3020 = vst [vmem:[#allocation3 + $0x20] sm:$0xff] %v2998_v28 }
0x1a57   :  { %v3788_v59 = vpop.eup %3787 }
0x1a58   :  { %2848 = vrot.lane.b32.xlu0 %v3788_v59, %s3832_s5 }
0x1a59   :  { %v3790_v61 = vpop.eup %3789 }
0x1a5a   :  { %v2842_v63 = vadd.f32 1.0, %v3790_v61 }
0x1a5c   :  { %3791 = vrcp.f32 %v2842_v63 }
0x1a69   :  { %v3792_v0 = vpop.eup %3791 }
0x1a6a   :  { %v2846_v4 = vmul.f32 %v3792_v0, %v4593_v22 }
0x1aca   :  { %v2849_v2 = vpop.permute.xlu0 %2848 }
0x1acb   :  { %v2851_v1 = vmul.f32 %v3792_v0, %v2849_v2 }
0x1acd   :  { %2853 = vrot.lane.b32.xlu1 %v2851_v1, %s3833_s8 }
0x1b3f   :  { %v2854_v6 = vpop.permute.xlu1 %2853 }
0x1b40   :  { %v2856_v8 = vadd.f32 %v2854_v6, %v2846_v4 }
0x1b42   :  { %3793 = vtanh.f32 %v2856_v8 }
0x1b4f   :  { %v3794_v10 = vpop.eup %3793 }
0x1b50   :  { %2859 = vrot.lane.b32.xlu0 %v3794_v10, %s3832_s5  ;;  %s3808_s5 = scalar_lea.vmem %s3030_s27, 1024 }
0x1b51   :  { %p3809_p0 = scmp.ne.s32.totalorder %s3030_s27, %s3808_s5  ;;  %p3814_p2 = scmp.lt.s32.totalorder %s3808_s5, %s3808_s5 }
0x1b53   :  { %p3815_p3 = por %p3814_p2, %p3813_p1 }
0x1b55   :  { %p3816_p4 = pnand %p3815_p3, %p3809_p0 }
0x1bc2   :  { %v2860_v12 = vpop.permute.xlu0 %2859 }
0x1bc3   :  { %v2862_v15 = vmul.f32 %v3792_v0, %v2860_v12 }
0x1bc5   :  { %2864 = vrot.lane.b32.xlu1 %v2862_v15, %s3833_s8 }
0x1c37   :  { %v2865_v9 = vpop.permute.xlu1 %2864 }
0x1c38   :  { %2867 = vst.msk [vmem:[#allocation2 + $0x38] sm:$0xff] %vm142_vm3, %v2865_v9 }
0x1c3f   :  { %v2875_v16 = vld [vmem:[#allocation2 + $0x38] sm:$0xff] }
0x1c40   :  { %3640 = vmatmul.mubr.msk.f32.gmra.mxu0 %vm142_vm3, %v2875_v16 }
0x1d00   :  { %v3641_v11 = vpop.f32.mrf.mxu0 }
0x1d01   :  { %v3013_v17 = vadd.f32 %v3641_v11, %v3099_v52 }
0x1d02   :  { %v3007_v13 = vpop.f32.mrf.mxu0 }
0x1d03   :  { %3023 = vst [vmem:[#allocation3 + $0x38] sm:$0xff] %v3013_v17  ;;  %v3008_v18 = vadd.f32 %v3099_v52, %v3007_v13 }
0x1d05   :  { %3022 = vst [vmem:[#allocation3 + $0x30] sm:$0xff] %v3008_v18 }
0x1d06   :  { %3819 = shalt.err (!%p3816_p4)
}
0x1d07   :  { %s3835_s8 = smov 128   ;;  %s3836_s28 = smov 8  }
0x1d08   :  { %3035 = dma.vmem_to_hbm [thread:$0]  %s3030_s27, 1024, %s4651_s14, [#allocation4], %s3835_s8, %s3835_s8, %s3836_s28  }
0x1d09   :  { %3828 = dma.done.wait [#allocation4], 1024  }
0x1d0a   :  { %3829 = vsyncadd [#allocation4], 4294966272 }
0x1d0b   :  { %3039 = vsyncpa [#allocation4], 1 }

</bundles_post_ra>
